<compile_context>
chip_gen: v6e
topology: v6e:2x2x1
jax: 0.10.0
libtpu: 0.0.40
codegen_flags: <defaults>
</compile_context>

<pallas_src>
import functools

import jax
import jax.numpy as jnp
from jax.experimental import pallas as pl
from jax.experimental.pallas import tpu as pltpu


def _attention_kernel(x_ref, wqkv_ref, wp_ref, bp_ref, o_ref, *,
                      batch: int, seq: int, num_heads: int, scale: float):
    bn, c = x_ref.shape                      # (B*N, C)
    d = c // num_heads

    x2 = x_ref[...]                          # (B*N, C)

    # Single fused QKV projection on the MXU (one pass, 3C-wide output).
    qkv = jnp.dot(x2, wqkv_ref[...], preferred_element_type=jnp.float32)  # (B*N, 3C)
    qkv = qkv.reshape(batch, seq, 3 * c)     # leading-dim split (layout-free)
    q = qkv[:, :, 0 * c:1 * c]               # (B, N, C)
    k = qkv[:, :, 1 * c:2 * c]
    v = qkv[:, :, 2 * c:3 * c]

    # Per-head scaled-dot-product attention, batched over B via 3-D einsums
    # with a leading batch dim (single batched contraction per head).
    # TODO(synk): optional attention mask (masked_fill with -inf) not wired in;
    # the reference forward with mask=None / dropout=0 is reproduced exactly.
    outs = []
    for h in range(num_heads):               # static, unrolled (H is small)
        lo = h * d
        qh = q[:, :, lo:lo + d]              # (B, N, D)
        kh = k[:, :, lo:lo + d]
        vh = v[:, :, lo:lo + d]

        s = jnp.einsum('bnd,bmd->bnm', qh, kh,
                       preferred_element_type=jnp.float32) * scale
        # Numerically stable softmax over keys.
        m = jnp.max(s, axis=-1, keepdims=True)
        p = jnp.exp(s - m)
        # EUP approximate reciprocal — otherwise-idle slot, cheap normalizer.
        p = p * pl.reciprocal(jnp.sum(p, axis=-1, keepdims=True), approx=True)

        outs.append(jnp.einsum('bnm,bmd->bnd', p, vh,
                               preferred_element_type=jnp.float32))

    attn_out = jnp.concatenate(outs, axis=-1)        # (B, N, C)
    attn_out = attn_out.reshape(batch * seq, c)      # leading-dim merge

    # Output projection + bias.
    y = jnp.dot(attn_out, wp_ref[...], preferred_element_type=jnp.float32)
    y = y + bp_ref[...]                              # (1, C) broadcasts over rows
    o_ref[...] = y.astype(o_ref.dtype)


def attention_pallas(x, wq, wk, wv, wproj, bproj, *, num_heads: int):
    """x: (B, N, C); w*: (C_out, C_in) PyTorch-layout weights; bproj: (C,)."""
    B, N, C = x.shape
    D = C // num_heads
    scale = D ** (-0.5)

    # Fuse the three projections: (C, 3C) = [Wq^T | Wk^T | Wv^T].
    wqkv = jnp.concatenate([wq.T, wk.T, wv.T], axis=1)
    wp_t = wproj.T
    bp2 = bproj.reshape(1, C)

    # Collapse (B, N) into the row axis: one grid-less call, whole working set
    # in VMEM (a few KiB here), no per-grid-step pipeline overhead.
    x2 = x.reshape(B * N, C)

    flops = 2 * B * N * C * (4 * C) + 4 * B * N * N * C   # QKV + proj + QK^T + PV
    transcendentals = B * num_heads * N * N                 # exp in softmax
    bytes_accessed = 4 * (x2.size + wqkv.size + wp_t.size + bp2.size + B * N * C)

    kernel = functools.partial(_attention_kernel, batch=B, seq=N,
                               num_heads=num_heads, scale=scale)

    vmem_spec = pl.BlockSpec(memory_space=pltpu.MemorySpace.VMEM)
    out2 = pl.pallas_call(
        kernel,
        out_shape=jax.ShapeDtypeStruct((B * N, C), x.dtype),
        in_specs=[vmem_spec, vmem_spec, vmem_spec, vmem_spec],
        out_specs=vmem_spec,
        cost_estimate=pl.CostEstimate(flops=int(flops),
                                      transcendentals=int(transcendentals),
                                      bytes_accessed=int(bytes_accessed)),
    )(x2, wqkv, wp_t, bp2)
    return out2.reshape(B, N, C)


def attention_reference(x, wq, wk, wv, wproj, bproj, *, num_heads: int):
    """Pure-JAX reference mirroring the PyTorch forward (mask=None, no dropout)."""
    B, N, C = x.shape
    D = C // num_heads
    scale = D ** (-0.5)

    def lin(x, w, b=None):
        y = jnp.einsum('bnc,oc->bno', x, w)
        return y if b is None else y + b

    q = lin(x, wq).reshape(B, N, num_heads, D).transpose(0, 2, 1, 3)
    k = lin(x, wk).reshape(B, N, num_heads, D).transpose(0, 2, 1, 3)
    v = lin(x, wv).reshape(B, N, num_heads, D).transpose(0, 2, 1, 3)
    attn = jnp.einsum('bhnd,bhmd->bhnm', q, k) * scale
    attn = jax.nn.softmax(attn, axis=-1)
    out = jnp.einsum('bhnm,bhmd->bhnd', attn, v)
    out = out.transpose(0, 2, 1, 3).reshape(B, N, C)
    return lin(out, wproj, bproj)


if __name__ == "__main__":
    # Small shapes consistent with the module: dim=32, num_heads=8 (head_dim=4).
    B, N, C, H = 2, 8, 32, 8

    key = jax.random.PRNGKey(0)
    kx, kq, kk, kv, kp, kb = jax.random.split(key, 6)

    x = jax.random.normal(kx, (B, N, C), dtype=jnp.float32)
    # Deterministic parameter init (PyTorch layout: (out_features, in_features)).
    wq = jax.random.normal(kq, (C, C), dtype=jnp.float32) * 0.05
    wk = jax.random.normal(kk, (C, C), dtype=jnp.float32) * 0.05
    wv = jax.random.normal(kv, (C, C), dtype=jnp.float32) * 0.05
    wproj = jax.random.normal(kp, (C, C), dtype=jnp.float32) * 0.05
    bproj = jax.random.normal(kb, (C,), dtype=jnp.float32) * 0.05

    out = attention_pallas(x, wq, wk, wv, wproj, bproj, num_heads=H)
    out = jax.block_until_ready(out)

    ref = attention_reference(x, wq, wk, wv, wproj, bproj, num_heads=H)
    assert out.shape == (B, N, C)
    # Slightly looser tolerance: softmax denominator uses the EUP approximate
    # reciprocal (pl.reciprocal(..., approx=True)).
    assert jnp.allclose(out, ref, atol=5e-3, rtol=5e-3), "mismatch vs reference"

    print("KERNEL_OK")
</pallas_src>

<mosaic_0001>
module attributes {stable_mosaic.version = 11 : i64} {
  func.func @_attention_kernel(%arg0: memref<16x32xf32, #tpu.memory_space<vmem>>, %arg1: memref<32x96xf32, #tpu.memory_space<vmem>>, %arg2: memref<32x32xf32, #tpu.memory_space<vmem>>, %arg3: memref<1x32xf32, #tpu.memory_space<vmem>>, %arg4: memref<16x32xf32, #tpu.memory_space<vmem>>) attributes {dimension_semantics = [], scalar_prefetch = 0 : i64, scratch_operands = 0 : i64, tpu.core_type = #tpu.core_type<tc>} {
    %c0 = arith.constant 0 : index
    %c0_0 = arith.constant 0 : index
    %0 = vector.load %arg0[%c0, %c0_0] : memref<16x32xf32, #tpu.memory_space<vmem>>, vector<16x32xf32>
    %c0_1 = arith.constant 0 : index
    %c0_2 = arith.constant 0 : index
    %1 = vector.load %arg1[%c0_1, %c0_2] : memref<32x96xf32, #tpu.memory_space<vmem>>, vector<32x96xf32>
    %cst = arith.constant dense<0.000000e+00> : vector<16x96xf32>
    %2 = tpu.matmul %0, %1, %cst {dimension_numbers = #tpu.dot_dimension_numbers<[1], [0], [0], [1], [0, 0, 1, 1], [], []>} : vector<16x32xf32>, vector<32x96xf32>, vector<16x96xf32> -> vector<16x96xf32>
    %3 = vector.shape_cast %2 : vector<16x96xf32> to vector<2x8x96xf32>
    %4 = vector.extract_strided_slice %3 {offsets = [0, 0, 0], sizes = [2, 8, 32], strides = [1, 1, 1]} : vector<2x8x96xf32> to vector<2x8x32xf32>
    %5 = vector.extract_strided_slice %3 {offsets = [0, 0, 32], sizes = [2, 8, 32], strides = [1, 1, 1]} : vector<2x8x96xf32> to vector<2x8x32xf32>
    %6 = vector.extract_strided_slice %3 {offsets = [0, 0, 64], sizes = [2, 8, 32], strides = [1, 1, 1]} : vector<2x8x96xf32> to vector<2x8x32xf32>
    %7 = vector.extract_strided_slice %4 {offsets = [0, 0, 0], sizes = [2, 8, 4], strides = [1, 1, 1]} : vector<2x8x32xf32> to vector<2x8x4xf32>
    %8 = vector.extract_strided_slice %5 {offsets = [0, 0, 0], sizes = [2, 8, 4], strides = [1, 1, 1]} : vector<2x8x32xf32> to vector<2x8x4xf32>
    %9 = vector.extract_strided_slice %6 {offsets = [0, 0, 0], sizes = [2, 8, 4], strides = [1, 1, 1]} : vector<2x8x32xf32> to vector<2x8x4xf32>
    "tpu.trace_start"() <{level = 10 : i32, message = "bnd,bmd->bnm"}> : () -> ()
    %cst_3 = arith.constant dense<0.000000e+00> : vector<2x8x8xf32>
    %10 = tpu.matmul %7, %8, %cst_3 {dimension_numbers = #tpu.dot_dimension_numbers<[2], [2], [1], [1], [0, 0, 0, 1, 1, 1], [0], [0]>} : vector<2x8x4xf32>, vector<2x8x4xf32>, vector<2x8x8xf32> -> vector<2x8x8xf32>
    "tpu.trace_stop"() : () -> ()
    %cst_4 = arith.constant 5.000000e-01 : f32
    %11 = vector.broadcast %cst_4 : f32 to vector<2x8x8xf32>
    %12 = arith.mulf %10, %11 : vector<2x8x8xf32>
    %cst_5 = arith.constant dense<0xFF800000> : vector<2x8xf32>
    %13 = vector.multi_reduction <maximumf>, %12, %cst_5 [2] : vector<2x8x8xf32> to vector<2x8xf32>
    %14 = vector.shape_cast %13 : vector<2x8xf32> to vector<2x8x1xf32>
    %15 = vector.broadcast %14 : vector<2x8x1xf32> to vector<2x8x8xf32>
    %16 = arith.subf %12, %15 : vector<2x8x8xf32>
    %17 = math.exp %16 : vector<2x8x8xf32>
    %cst_6 = arith.constant dense<0.000000e+00> : vector<2x8xf32>
    %18 = vector.multi_reduction <add>, %17, %cst_6 [2] : vector<2x8x8xf32> to vector<2x8xf32>
    %19 = vector.shape_cast %18 : vector<2x8xf32> to vector<2x8x1xf32>
    %20 = tpu.reciprocal %19 {approx = true} : vector<2x8x1xf32> -> vector<2x8x1xf32>
    %21 = vector.broadcast %20 : vector<2x8x1xf32> to vector<2x8x8xf32>
    %22 = arith.mulf %17, %21 : vector<2x8x8xf32>
    "tpu.trace_start"() <{level = 10 : i32, message = "bnm,bmd->bnd"}> : () -> ()
    %cst_7 = arith.constant dense<0.000000e+00> : vector<2x8x4xf32>
    %23 = tpu.matmul %22, %9, %cst_7 {dimension_numbers = #tpu.dot_dimension_numbers<[2], [1], [1], [2], [0, 0, 0, 1, 1, 2], [0], [0]>} : vector<2x8x8xf32>, vector<2x8x4xf32>, vector<2x8x4xf32> -> vector<2x8x4xf32>
    "tpu.trace_stop"() : () -> ()
    %24 = vector.extract_strided_slice %4 {offsets = [0, 0, 4], sizes = [2, 8, 4], strides = [1, 1, 1]} : vector<2x8x32xf32> to vector<2x8x4xf32>
    %25 = vector.extract_strided_slice %5 {offsets = [0, 0, 4], sizes = [2, 8, 4], strides = [1, 1, 1]} : vector<2x8x32xf32> to vector<2x8x4xf32>
    %26 = vector.extract_strided_slice %6 {offsets = [0, 0, 4], sizes = [2, 8, 4], strides = [1, 1, 1]} : vector<2x8x32xf32> to vector<2x8x4xf32>
    "tpu.trace_start"() <{level = 10 : i32, message = "bnd,bmd->bnm"}> : () -> ()
    %cst_8 = arith.constant dense<0.000000e+00> : vector<2x8x8xf32>
    %27 = tpu.matmul %24, %25, %cst_8 {dimension_numbers = #tpu.dot_dimension_numbers<[2], [2], [1], [1], [0, 0, 0, 1, 1, 1], [0], [0]>} : vector<2x8x4xf32>, vector<2x8x4xf32>, vector<2x8x8xf32> -> vector<2x8x8xf32>
    "tpu.trace_stop"() : () -> ()
    %cst_9 = arith.constant 5.000000e-01 : f32
    %28 = vector.broadcast %cst_9 : f32 to vector<2x8x8xf32>
    %29 = arith.mulf %27, %28 : vector<2x8x8xf32>
    %cst_10 = arith.constant dense<0xFF800000> : vector<2x8xf32>
    %30 = vector.multi_reduction <maximumf>, %29, %cst_10 [2] : vector<2x8x8xf32> to vector<2x8xf32>
    %31 = vector.shape_cast %30 : vector<2x8xf32> to vector<2x8x1xf32>
    %32 = vector.broadcast %31 : vector<2x8x1xf32> to vector<2x8x8xf32>
    %33 = arith.subf %29, %32 : vector<2x8x8xf32>
    %34 = math.exp %33 : vector<2x8x8xf32>
    %cst_11 = arith.constant dense<0.000000e+00> : vector<2x8xf32>
    %35 = vector.multi_reduction <add>, %34, %cst_11 [2] : vector<2x8x8xf32> to vector<2x8xf32>
    %36 = vector.shape_cast %35 : vector<2x8xf32> to vector<2x8x1xf32>
    %37 = tpu.reciprocal %36 {approx = true} : vector<2x8x1xf32> -> vector<2x8x1xf32>
    %38 = vector.broadcast %37 : vector<2x8x1xf32> to vector<2x8x8xf32>
    %39 = arith.mulf %34, %38 : vector<2x8x8xf32>
    "tpu.trace_start"() <{level = 10 : i32, message = "bnm,bmd->bnd"}> : () -> ()
    %cst_12 = arith.constant dense<0.000000e+00> : vector<2x8x4xf32>
    %40 = tpu.matmul %39, %26, %cst_12 {dimension_numbers = #tpu.dot_dimension_numbers<[2], [1], [1], [2], [0, 0, 0, 1, 1, 2], [0], [0]>} : vector<2x8x8xf32>, vector<2x8x4xf32>, vector<2x8x4xf32> -> vector<2x8x4xf32>
    "tpu.trace_stop"() : () -> ()
    %41 = vector.extract_strided_slice %4 {offsets = [0, 0, 8], sizes = [2, 8, 4], strides = [1, 1, 1]} : vector<2x8x32xf32> to vector<2x8x4xf32>
    %42 = vector.extract_strided_slice %5 {offsets = [0, 0, 8], sizes = [2, 8, 4], strides = [1, 1, 1]} : vector<2x8x32xf32> to vector<2x8x4xf32>
    %43 = vector.extract_strided_slice %6 {offsets = [0, 0, 8], sizes = [2, 8, 4], strides = [1, 1, 1]} : vector<2x8x32xf32> to vector<2x8x4xf32>
    "tpu.trace_start"() <{level = 10 : i32, message = "bnd,bmd->bnm"}> : () -> ()
    %cst_13 = arith.constant dense<0.000000e+00> : vector<2x8x8xf32>
    %44 = tpu.matmul %41, %42, %cst_13 {dimension_numbers = #tpu.dot_dimension_numbers<[2], [2], [1], [1], [0, 0, 0, 1, 1, 1], [0], [0]>} : vector<2x8x4xf32>, vector<2x8x4xf32>, vector<2x8x8xf32> -> vector<2x8x8xf32>
    "tpu.trace_stop"() : () -> ()
    %cst_14 = arith.constant 5.000000e-01 : f32
    %45 = vector.broadcast %cst_14 : f32 to vector<2x8x8xf32>
    %46 = arith.mulf %44, %45 : vector<2x8x8xf32>
    %cst_15 = arith.constant dense<0xFF800000> : vector<2x8xf32>
    %47 = vector.multi_reduction <maximumf>, %46, %cst_15 [2] : vector<2x8x8xf32> to vector<2x8xf32>
    %48 = vector.shape_cast %47 : vector<2x8xf32> to vector<2x8x1xf32>
    %49 = vector.broadcast %48 : vector<2x8x1xf32> to vector<2x8x8xf32>
    %50 = arith.subf %46, %49 : vector<2x8x8xf32>
    %51 = math.exp %50 : vector<2x8x8xf32>
    %cst_16 = arith.constant dense<0.000000e+00> : vector<2x8xf32>
    %52 = vector.multi_reduction <add>, %51, %cst_16 [2] : vector<2x8x8xf32> to vector<2x8xf32>
    %53 = vector.shape_cast %52 : vector<2x8xf32> to vector<2x8x1xf32>
    %54 = tpu.reciprocal %53 {approx = true} : vector<2x8x1xf32> -> vector<2x8x1xf32>
    %55 = vector.broadcast %54 : vector<2x8x1xf32> to vector<2x8x8xf32>
    %56 = arith.mulf %51, %55 : vector<2x8x8xf32>
    "tpu.trace_start"() <{level = 10 : i32, message = "bnm,bmd->bnd"}> : () -> ()
    %cst_17 = arith.constant dense<0.000000e+00> : vector<2x8x4xf32>
    %57 = tpu.matmul %56, %43, %cst_17 {dimension_numbers = #tpu.dot_dimension_numbers<[2], [1], [1], [2], [0, 0, 0, 1, 1, 2], [0], [0]>} : vector<2x8x8xf32>, vector<2x8x4xf32>, vector<2x8x4xf32> -> vector<2x8x4xf32>
    "tpu.trace_stop"() : () -> ()
    %58 = vector.extract_strided_slice %4 {offsets = [0, 0, 12], sizes = [2, 8, 4], strides = [1, 1, 1]} : vector<2x8x32xf32> to vector<2x8x4xf32>
    %59 = vector.extract_strided_slice %5 {offsets = [0, 0, 12], sizes = [2, 8, 4], strides = [1, 1, 1]} : vector<2x8x32xf32> to vector<2x8x4xf32>
    %60 = vector.extract_strided_slice %6 {offsets = [0, 0, 12], sizes = [2, 8, 4], strides = [1, 1, 1]} : vector<2x8x32xf32> to vector<2x8x4xf32>
    "tpu.trace_start"() <{level = 10 : i32, message = "bnd,bmd->bnm"}> : () -> ()
    %cst_18 = arith.constant dense<0.000000e+00> : vector<2x8x8xf32>
    %61 = tpu.matmul %58, %59, %cst_18 {dimension_numbers = #tpu.dot_dimension_numbers<[2], [2], [1], [1], [0, 0, 0, 1, 1, 1], [0], [0]>} : vector<2x8x4xf32>, vector<2x8x4xf32>, vector<2x8x8xf32> -> vector<2x8x8xf32>
    "tpu.trace_stop"() : () -> ()
    %cst_19 = arith.constant 5.000000e-01 : f32
    %62 = vector.broadcast %cst_19 : f32 to vector<2x8x8xf32>
    %63 = arith.mulf %61, %62 : vector<2x8x8xf32>
    %cst_20 = arith.constant dense<0xFF800000> : vector<2x8xf32>
    %64 = vector.multi_reduction <maximumf>, %63, %cst_20 [2] : vector<2x8x8xf32> to vector<2x8xf32>
    %65 = vector.shape_cast %64 : vector<2x8xf32> to vector<2x8x1xf32>
    %66 = vector.broadcast %65 : vector<2x8x1xf32> to vector<2x8x8xf32>
    %67 = arith.subf %63, %66 : vector<2x8x8xf32>
    %68 = math.exp %67 : vector<2x8x8xf32>
    %cst_21 = arith.constant dense<0.000000e+00> : vector<2x8xf32>
    %69 = vector.multi_reduction <add>, %68, %cst_21 [2] : vector<2x8x8xf32> to vector<2x8xf32>
    %70 = vector.shape_cast %69 : vector<2x8xf32> to vector<2x8x1xf32>
    %71 = tpu.reciprocal %70 {approx = true} : vector<2x8x1xf32> -> vector<2x8x1xf32>
    %72 = vector.broadcast %71 : vector<2x8x1xf32> to vector<2x8x8xf32>
    %73 = arith.mulf %68, %72 : vector<2x8x8xf32>
    "tpu.trace_start"() <{level = 10 : i32, message = "bnm,bmd->bnd"}> : () -> ()
    %cst_22 = arith.constant dense<0.000000e+00> : vector<2x8x4xf32>
    %74 = tpu.matmul %73, %60, %cst_22 {dimension_numbers = #tpu.dot_dimension_numbers<[2], [1], [1], [2], [0, 0, 0, 1, 1, 2], [0], [0]>} : vector<2x8x8xf32>, vector<2x8x4xf32>, vector<2x8x4xf32> -> vector<2x8x4xf32>
    "tpu.trace_stop"() : () -> ()
    %75 = vector.extract_strided_slice %4 {offsets = [0, 0, 16], sizes = [2, 8, 4], strides = [1, 1, 1]} : vector<2x8x32xf32> to vector<2x8x4xf32>
    %76 = vector.extract_strided_slice %5 {offsets = [0, 0, 16], sizes = [2, 8, 4], strides = [1, 1, 1]} : vector<2x8x32xf32> to vector<2x8x4xf32>
    %77 = vector.extract_strided_slice %6 {offsets = [0, 0, 16], sizes = [2, 8, 4], strides = [1, 1, 1]} : vector<2x8x32xf32> to vector<2x8x4xf32>
    "tpu.trace_start"() <{level = 10 : i32, message = "bnd,bmd->bnm"}> : () -> ()
    %cst_23 = arith.constant dense<0.000000e+00> : vector<2x8x8xf32>
    %78 = tpu.matmul %75, %76, %cst_23 {dimension_numbers = #tpu.dot_dimension_numbers<[2], [2], [1], [1], [0, 0, 0, 1, 1, 1], [0], [0]>} : vector<2x8x4xf32>, vector<2x8x4xf32>, vector<2x8x8xf32> -> vector<2x8x8xf32>
    "tpu.trace_stop"() : () -> ()
    %cst_24 = arith.constant 5.000000e-01 : f32
    %79 = vector.broadcast %cst_24 : f32 to vector<2x8x8xf32>
    %80 = arith.mulf %78, %79 : vector<2x8x8xf32>
    %cst_25 = arith.constant dense<0xFF800000> : vector<2x8xf32>
    %81 = vector.multi_reduction <maximumf>, %80, %cst_25 [2] : vector<2x8x8xf32> to vector<2x8xf32>
    %82 = vector.shape_cast %81 : vector<2x8xf32> to vector<2x8x1xf32>
    %83 = vector.broadcast %82 : vector<2x8x1xf32> to vector<2x8x8xf32>
    %84 = arith.subf %80, %83 : vector<2x8x8xf32>
    %85 = math.exp %84 : vector<2x8x8xf32>
    %cst_26 = arith.constant dense<0.000000e+00> : vector<2x8xf32>
    %86 = vector.multi_reduction <add>, %85, %cst_26 [2] : vector<2x8x8xf32> to vector<2x8xf32>
    %87 = vector.shape_cast %86 : vector<2x8xf32> to vector<2x8x1xf32>
    %88 = tpu.reciprocal %87 {approx = true} : vector<2x8x1xf32> -> vector<2x8x1xf32>
    %89 = vector.broadcast %88 : vector<2x8x1xf32> to vector<2x8x8xf32>
    %90 = arith.mulf %85, %89 : vector<2x8x8xf32>
    "tpu.trace_start"() <{level = 10 : i32, message = "bnm,bmd->bnd"}> : () -> ()
    %cst_27 = arith.constant dense<0.000000e+00> : vector<2x8x4xf32>
    %91 = tpu.matmul %90, %77, %cst_27 {dimension_numbers = #tpu.dot_dimension_numbers<[2], [1], [1], [2], [0, 0, 0, 1, 1, 2], [0], [0]>} : vector<2x8x8xf32>, vector<2x8x4xf32>, vector<2x8x4xf32> -> vector<2x8x4xf32>
    "tpu.trace_stop"() : () -> ()
    %92 = vector.extract_strided_slice %4 {offsets = [0, 0, 20], sizes = [2, 8, 4], strides = [1, 1, 1]} : vector<2x8x32xf32> to vector<2x8x4xf32>
    %93 = vector.extract_strided_slice %5 {offsets = [0, 0, 20], sizes = [2, 8, 4], strides = [1, 1, 1]} : vector<2x8x32xf32> to vector<2x8x4xf32>
    %94 = vector.extract_strided_slice %6 {offsets = [0, 0, 20], sizes = [2, 8, 4], strides = [1, 1, 1]} : vector<2x8x32xf32> to vector<2x8x4xf32>
    "tpu.trace_start"() <{level = 10 : i32, message = "bnd,bmd->bnm"}> : () -> ()
    %cst_28 = arith.constant dense<0.000000e+00> : vector<2x8x8xf32>
    %95 = tpu.matmul %92, %93, %cst_28 {dimension_numbers = #tpu.dot_dimension_numbers<[2], [2], [1], [1], [0, 0, 0, 1, 1, 1], [0], [0]>} : vector<2x8x4xf32>, vector<2x8x4xf32>, vector<2x8x8xf32> -> vector<2x8x8xf32>
    "tpu.trace_stop"() : () -> ()
    %cst_29 = arith.constant 5.000000e-01 : f32
    %96 = vector.broadcast %cst_29 : f32 to vector<2x8x8xf32>
    %97 = arith.mulf %95, %96 : vector<2x8x8xf32>
    %cst_30 = arith.constant dense<0xFF800000> : vector<2x8xf32>
    %98 = vector.multi_reduction <maximumf>, %97, %cst_30 [2] : vector<2x8x8xf32> to vector<2x8xf32>
    %99 = vector.shape_cast %98 : vector<2x8xf32> to vector<2x8x1xf32>
    %100 = vector.broadcast %99 : vector<2x8x1xf32> to vector<2x8x8xf32>
    %101 = arith.subf %97, %100 : vector<2x8x8xf32>
    %102 = math.exp %101 : vector<2x8x8xf32>
    %cst_31 = arith.constant dense<0.000000e+00> : vector<2x8xf32>
    %103 = vector.multi_reduction <add>, %102, %cst_31 [2] : vector<2x8x8xf32> to vector<2x8xf32>
    %104 = vector.shape_cast %103 : vector<2x8xf32> to vector<2x8x1xf32>
    %105 = tpu.reciprocal %104 {approx = true} : vector<2x8x1xf32> -> vector<2x8x1xf32>
    %106 = vector.broadcast %105 : vector<2x8x1xf32> to vector<2x8x8xf32>
    %107 = arith.mulf %102, %106 : vector<2x8x8xf32>
    "tpu.trace_start"() <{level = 10 : i32, message = "bnm,bmd->bnd"}> : () -> ()
    %cst_32 = arith.constant dense<0.000000e+00> : vector<2x8x4xf32>
    %108 = tpu.matmul %107, %94, %cst_32 {dimension_numbers = #tpu.dot_dimension_numbers<[2], [1], [1], [2], [0, 0, 0, 1, 1, 2], [0], [0]>} : vector<2x8x8xf32>, vector<2x8x4xf32>, vector<2x8x4xf32> -> vector<2x8x4xf32>
    "tpu.trace_stop"() : () -> ()
    %109 = vector.extract_strided_slice %4 {offsets = [0, 0, 24], sizes = [2, 8, 4], strides = [1, 1, 1]} : vector<2x8x32xf32> to vector<2x8x4xf32>
    %110 = vector.extract_strided_slice %5 {offsets = [0, 0, 24], sizes = [2, 8, 4], strides = [1, 1, 1]} : vector<2x8x32xf32> to vector<2x8x4xf32>
    %111 = vector.extract_strided_slice %6 {offsets = [0, 0, 24], sizes = [2, 8, 4], strides = [1, 1, 1]} : vector<2x8x32xf32> to vector<2x8x4xf32>
    "tpu.trace_start"() <{level = 10 : i32, message = "bnd,bmd->bnm"}> : () -> ()
    %cst_33 = arith.constant dense<0.000000e+00> : vector<2x8x8xf32>
    %112 = tpu.matmul %109, %110, %cst_33 {dimension_numbers = #tpu.dot_dimension_numbers<[2], [2], [1], [1], [0, 0, 0, 1, 1, 1], [0], [0]>} : vector<2x8x4xf32>, vector<2x8x4xf32>, vector<2x8x8xf32> -> vector<2x8x8xf32>
    "tpu.trace_stop"() : () -> ()
    %cst_34 = arith.constant 5.000000e-01 : f32
    %113 = vector.broadcast %cst_34 : f32 to vector<2x8x8xf32>
    %114 = arith.mulf %112, %113 : vector<2x8x8xf32>
    %cst_35 = arith.constant dense<0xFF800000> : vector<2x8xf32>
    %115 = vector.multi_reduction <maximumf>, %114, %cst_35 [2] : vector<2x8x8xf32> to vector<2x8xf32>
    %116 = vector.shape_cast %115 : vector<2x8xf32> to vector<2x8x1xf32>
    %117 = vector.broadcast %116 : vector<2x8x1xf32> to vector<2x8x8xf32>
    %118 = arith.subf %114, %117 : vector<2x8x8xf32>
    %119 = math.exp %118 : vector<2x8x8xf32>
    %cst_36 = arith.constant dense<0.000000e+00> : vector<2x8xf32>
    %120 = vector.multi_reduction <add>, %119, %cst_36 [2] : vector<2x8x8xf32> to vector<2x8xf32>
    %121 = vector.shape_cast %120 : vector<2x8xf32> to vector<2x8x1xf32>
    %122 = tpu.reciprocal %121 {approx = true} : vector<2x8x1xf32> -> vector<2x8x1xf32>
    %123 = vector.broadcast %122 : vector<2x8x1xf32> to vector<2x8x8xf32>
    %124 = arith.mulf %119, %123 : vector<2x8x8xf32>
    "tpu.trace_start"() <{level = 10 : i32, message = "bnm,bmd->bnd"}> : () -> ()
    %cst_37 = arith.constant dense<0.000000e+00> : vector<2x8x4xf32>
    %125 = tpu.matmul %124, %111, %cst_37 {dimension_numbers = #tpu.dot_dimension_numbers<[2], [1], [1], [2], [0, 0, 0, 1, 1, 2], [0], [0]>} : vector<2x8x8xf32>, vector<2x8x4xf32>, vector<2x8x4xf32> -> vector<2x8x4xf32>
    "tpu.trace_stop"() : () -> ()
    %126 = vector.extract_strided_slice %4 {offsets = [0, 0, 28], sizes = [2, 8, 4], strides = [1, 1, 1]} : vector<2x8x32xf32> to vector<2x8x4xf32>
    %127 = vector.extract_strided_slice %5 {offsets = [0, 0, 28], sizes = [2, 8, 4], strides = [1, 1, 1]} : vector<2x8x32xf32> to vector<2x8x4xf32>
    %128 = vector.extract_strided_slice %6 {offsets = [0, 0, 28], sizes = [2, 8, 4], strides = [1, 1, 1]} : vector<2x8x32xf32> to vector<2x8x4xf32>
    "tpu.trace_start"() <{level = 10 : i32, message = "bnd,bmd->bnm"}> : () -> ()
    %cst_38 = arith.constant dense<0.000000e+00> : vector<2x8x8xf32>
    %129 = tpu.matmul %126, %127, %cst_38 {dimension_numbers = #tpu.dot_dimension_numbers<[2], [2], [1], [1], [0, 0, 0, 1, 1, 1], [0], [0]>} : vector<2x8x4xf32>, vector<2x8x4xf32>, vector<2x8x8xf32> -> vector<2x8x8xf32>
    "tpu.trace_stop"() : () -> ()
    %cst_39 = arith.constant 5.000000e-01 : f32
    %130 = vector.broadcast %cst_39 : f32 to vector<2x8x8xf32>
    %131 = arith.mulf %129, %130 : vector<2x8x8xf32>
    %cst_40 = arith.constant dense<0xFF800000> : vector<2x8xf32>
    %132 = vector.multi_reduction <maximumf>, %131, %cst_40 [2] : vector<2x8x8xf32> to vector<2x8xf32>
    %133 = vector.shape_cast %132 : vector<2x8xf32> to vector<2x8x1xf32>
    %134 = vector.broadcast %133 : vector<2x8x1xf32> to vector<2x8x8xf32>
    %135 = arith.subf %131, %134 : vector<2x8x8xf32>
    %136 = math.exp %135 : vector<2x8x8xf32>
    %cst_41 = arith.constant dense<0.000000e+00> : vector<2x8xf32>
    %137 = vector.multi_reduction <add>, %136, %cst_41 [2] : vector<2x8x8xf32> to vector<2x8xf32>
    %138 = vector.shape_cast %137 : vector<2x8xf32> to vector<2x8x1xf32>
    %139 = tpu.reciprocal %138 {approx = true} : vector<2x8x1xf32> -> vector<2x8x1xf32>
    %140 = vector.broadcast %139 : vector<2x8x1xf32> to vector<2x8x8xf32>
    %141 = arith.mulf %136, %140 : vector<2x8x8xf32>
    "tpu.trace_start"() <{level = 10 : i32, message = "bnm,bmd->bnd"}> : () -> ()
    %cst_42 = arith.constant dense<0.000000e+00> : vector<2x8x4xf32>
    %142 = tpu.matmul %141, %128, %cst_42 {dimension_numbers = #tpu.dot_dimension_numbers<[2], [1], [1], [2], [0, 0, 0, 1, 1, 2], [0], [0]>} : vector<2x8x8xf32>, vector<2x8x4xf32>, vector<2x8x4xf32> -> vector<2x8x4xf32>
    "tpu.trace_stop"() : () -> ()
    %143 = tpu.concatenate %23, %40, %57, %74, %91, %108, %125, %142 in 2 : vector<2x8x4xf32>, vector<2x8x4xf32>, vector<2x8x4xf32>, vector<2x8x4xf32>, vector<2x8x4xf32>, vector<2x8x4xf32>, vector<2x8x4xf32>, vector<2x8x4xf32> -> vector<2x8x32xf32>
    %144 = vector.shape_cast %143 : vector<2x8x32xf32> to vector<16x32xf32>
    %c0_43 = arith.constant 0 : index
    %c0_44 = arith.constant 0 : index
    %145 = vector.load %arg2[%c0_43, %c0_44] : memref<32x32xf32, #tpu.memory_space<vmem>>, vector<32x32xf32>
    %cst_45 = arith.constant dense<0.000000e+00> : vector<16x32xf32>
    %146 = tpu.matmul %144, %145, %cst_45 {dimension_numbers = #tpu.dot_dimension_numbers<[1], [0], [0], [1], [0, 0, 1, 1], [], []>} : vector<16x32xf32>, vector<32x32xf32>, vector<16x32xf32> -> vector<16x32xf32>
    %c0_46 = arith.constant 0 : index
    %c0_47 = arith.constant 0 : index
    %147 = vector.load %arg3[%c0_46, %c0_47] : memref<1x32xf32, #tpu.memory_space<vmem>>, vector<1x32xf32>
    %148 = vector.broadcast %147 : vector<1x32xf32> to vector<16x32xf32>
    %149 = arith.addf %146, %148 : vector<16x32xf32>
    %c0_48 = arith.constant 0 : index
    %c0_49 = arith.constant 0 : index
    %150 = vector.load %arg4[%c0_48, %c0_49] : memref<16x32xf32, #tpu.memory_space<vmem>>, vector<16x32xf32>
    tpu.vector_store %arg4[%c0_48, %c0_49], %149 {strides = array<i32>} : memref<16x32xf32, #tpu.memory_space<vmem>>, vector<16x32xf32>,
    return
  }
}

</mosaic_0001>

<bundles_post_ra>
// kernel: tpu_custom_call.1
= control target key start
LH: loop header
LB: loop body
LE: loop exit
PB: predicated region body
PF: predicated region fallthrough
CT: control target
= control target key end

     0   :  { %9 = vsyncpa [#allocation3], 0  ;;  %s3861_s0 = inlined_call_operand.hbm [shape: f32[16,32], index: 0, kind: input, shape index: {}]   ;;  %s3862_s1 = inlined_call_operand.hbm [shape: f32[32,96], index: 1, kind: input, shape index: {}]   ;;  %s3863_s2 = inlined_call_operand.hbm [shape: f32[32,32], index: 2, kind: input, shape index: {}]   ;;  %s3864_s3 = inlined_call_operand.vmem [shape: f32[1,32], index: 3, kind: input, shape index: {}]   ;;  %s3865_s4 = inlined_call_operand.hbm [shape: f32[16,32], index: 4, kind: output, shape index: {}]  }
   0x1   :  { %10 = vsyncpa [#allocation6], 0 }
   0x2   :  { %11 = vsyncpa [#allocation4], 0  ;;  %s3488_s15 = smov [#allocation5]   ;;  %s3489_s17 = smov [#allocation2]  }
   0x3   :  { %s29_s16 = sshll.u32 %s3488_s15, 4  ;;  %s17_s18 = sshll.u32 %s3489_s17, 4  ;;  %s30_s16 = int_to_ptr.vmem [resolvable:$true] %s29_s16  ;;  %s18_s18 = int_to_ptr.vmem [resolvable:$true] %s17_s18 }
   0x4   :  { %s3410_s19 = scalar_lea.vmem %s30_s16, 512  ;;  %p3415_p1 = scmp.lt.s32.totalorder %s30_s16, %s30_s16 }
   0x5   :  { %p3411_p0 = scmp.ne.s32.totalorder %s30_s16, %s3410_s19  ;;  %p3416_p2 = scmp.lt.s32.totalorder %s3410_s19, %s3410_s19 }
   0x7   :  { %p3417_p3 = por %p3416_p2, %p3415_p1 }
   0x9   :  { %p3418_p4 = pnand %p3417_p3, %p3411_p0 }
   0xb   :  { %3421 = shalt.err (!%p3418_p4)
}
   0xc   :  { %s3490_s20 = smov 128   ;;  %s3491_s21 = smov 8  }
   0xd   :  { %35 = dma.hbm_to_vmem [thread:$0]  %s3862_s1, 512, %s30_s16, [#allocation6], %s3490_s20, %s3490_s20, %s3491_s21  }
   0xe   :  { %s3430_s24 = scalar_lea.vmem %s18_s18, 256  ;;  %p3435_p6 = scmp.lt.s32.totalorder %s18_s18, %s18_s18 }
   0xf   :  { %p3431_p5 = scmp.ne.s32.totalorder %s18_s18, %s3430_s24  ;;  %p3436_p7 = scmp.lt.s32.totalorder %s3430_s24, %s3430_s24 }
  0x11   :  { %p3437_p8 = por %p3436_p7, %p3435_p6 }
  0x13   :  { %p3438_p9 = pnand %p3437_p8, %p3431_p5 }
  0x15   :  { %3441 = shalt.err (!%p3438_p9)
}
  0x16   :  { %23 = dma.hbm_to_vmem [thread:$0]  %s3861_s0, 256, %s18_s18, [#allocation3], %s3490_s20, %s3490_s20, %s3491_s21  }
  0x17   :  { %s3492_s27 = smov [#allocation7]  }
  0x18   :  { %s41_s28 = sshll.u32 %s3492_s27, 4  ;;  %s42_s28 = int_to_ptr.vmem [resolvable:$true] %s41_s28 }
  0x19   :  { %s3450_s29 = scalar_lea.vmem %s42_s28, 512  ;;  %p3455_p11 = scmp.lt.s32.totalorder %s42_s28, %s42_s28 }
  0x1a   :  { %p3451_p10 = scmp.ne.s32.totalorder %s42_s28, %s3450_s29  ;;  %p3456_p12 = scmp.lt.s32.totalorder %s3450_s29, %s3450_s29 }
  0x1c   :  { %p3457_p13 = por %p3456_p12, %p3455_p11 }
  0x1e   :  { %p3458_p0 = pnand %p3457_p13, %p3451_p10 }
  0x20   :  { %3461 = shalt.err (!%p3458_p0)
}
  0x21   :  { %47 = dma.hbm_to_vmem [thread:$0]  %s3863_s2, 512, %s42_s28, [#allocation6], %s3490_s20, %s3490_s20, %s3491_s21  }
  0x22   :  { %3482 = dma.done.wait [#allocation3], 256  }
  0x23   :  { %3483 = vsyncadd [#allocation3], 4294967040 }
  0x24   :  { %3484 = dma.done.wait [#allocation6], 1024  }
  0x25   :  { %3485 = vsyncadd [#allocation6], 4294966272  ;;  %vm65_vm0 = vcmask 261120   ;;  %v64_v0 = vld [vmem:[#allocation5 + $0x18] sm:$0xff]  ;;  %v63_v1 = vld [vmem:[#allocation5 + $0x10] sm:$0xff]  ;;  %v3493_v6 = vmov 0.0  }
  0x26   :  { %3119 = vmatprep.subr.mxu0 %v64_v0  ;;  %v59_v2 = vld [vmem:[#allocation2] sm:$0xff]  ;;  %v62_v3 = vld [vmem:[#allocation5 + $0x8] sm:$0xff]  ;;  %v61_v4 = vld [vmem:[#allocation5] sm:$0xff]  ;;  %3130 = vmatprep.subr.mxu1 %v3493_v6  ;;  %vm3494_vm1 = vmmov 0   ;;  %s3495_s0 = smov 96   ;;  %vm150_vm2 = vcmask 31744  }
  0x27   :  { %3120 = vmatpush3.msra.mxu0 %v64_v0  ;;  %3127 = vmatprep.mubr.msk.f32.mxu0 %vm65_vm0, %v59_v2  ;;  %v60_v5 = vld [vmem:[#allocation2 + $0x8] sm:$0xff]  ;;  %vm304_vm3 = vcmask 64512   ;;  %s3496_s2 = smov 64   ;;  %s3497_s5 = smov 92   ;;  %vm2863_vm4 = vcmask 97280   ;;  %vm2866_vm5 = vcmask 130048  }
  0x28   :  { %3121 = vmatprep.subr.mxu0 %v63_v1  ;;  %3132 = vmatprep.mubr.msk.f32.mxu1 %vm3494_vm1, %v3493_v6  ;;  %s3498_s6 = smov 124   ;;  %s3499_s7 = smov 60   ;;  %vm2869_vm6 = vcmask 162816   ;;  %vm2875_vm7 = vcmask 228352   ;;  %vm2872_vm8 = vcmask 195584  }
  0x29   :  { %3122 = vmatpush3.msra.mxu0 %v63_v1  ;;  %s3500_s8 = smov 120   ;;  %s3501_s9 = smov 88  }
  0x2a   :  { %3123 = vmatprep.subr.mxu0 %v62_v3  ;;  %s3502_s10 = smov 56   ;;  %s3503_s11 = smov 84  }
  0x2b   :  { %3124 = vmatpush3.msra.mxu0 %v62_v3  ;;  %s3504_s12 = smov 116   ;;  %s3505_s13 = smov 52  }
  0x2c   :  { %3125 = vmatprep.subr.mxu0 %v61_v4  ;;  %s3506_s14 = smov 80   ;;  %s3507_s15 = smov 112  }
  0x2d   :  { %3126 = vmatpush3.msra.mxu0 %v61_v4  ;;  %s3508_s16 = smov 48   ;;  %s3509_s17 = smov 76  }
  0x2e   :  { %3128 = vmatmul.mubr.msk.f32.vlgmr.msra.gmra.mxu0 %vm65_vm0, %v60_v5  ;;  %3150 = vmatprep.subr.mxu0 %v3493_v6  ;;  %s3510_s18 = smov 108   ;;  %s3511_s19 = smov 44  }
  0x2f   :  { %3152 = vmatprep.mubr.msk.f32.mxu0 %vm3494_vm1, %v3493_v6  ;;  %s3512_s22 = smov 72   ;;  %s3513_s23 = smov 104  }
  0x30   :  { %s3514_s24 = smov 40   ;;  %s3515_s25 = smov 68  }
  0x31   :  { %s3516_s26 = smov 100   ;;  %s3517_s27 = smov 36  }
  0x32   :  { %s3518_s28 = smov 4   ;;  %s3519_s29 = smov 12  }
  0x33   :  { %s3520_s1 = smov 16   ;;  %s3521_s30 = smov 20  }
  0xee   :  { %v3576_v7 = vpop.f32.mrf.mxu0 }
  0xf0   :  { %v3578_v8 = vpop.f32.mrf.mxu0 }
  0xf1   :  { %148 = vrot.lane.b32.xlu0 %v3578_v8, %s3495_s0 }
  0xf5   :  { %226 = vrot.lane.b32.xlu0 %v3576_v7, %s3495_s0  ;;  %s3522_s0 = smov 24  }
 0x163   :  { %v149_v9 = vpop.permute.xlu0 %148 }
 0x164   :  { %3131 = vmatpush3.xpose.msk.msra.mxu1 %vm150_vm2, %v149_v9 }
 0x165   :  { %3135 = vmatprep.subr.mxu1 %v3493_v6 }
 0x167   :  { %3133 = vmatmul.mubr.msk.f32.vlgmr.msra.gmra.mxu1 %vm150_vm2, %v3578_v8  ;;  %v227_v10 = vpop.permute.xlu0 %226 }
 0x168   :  { %3136 = vmatpush3.xpose.msk.msra.mxu1 %vm150_vm2, %v227_v10  ;;  %3137 = vmatprep.mubr.msk.f32.mxu1 %vm3494_vm1, %v3493_v6 }
 0x169   :  { %3140 = vmatprep.subr.mxu1 %v3493_v6 }
 0x16b   :  { %3138 = vmatmul.mubr.msk.f32.vlgmr.msra.gmra.mxu1 %vm150_vm2, %v3576_v7 }
 0x16c   :  { %3142 = vmatprep.mubr.msk.f32.mxu1 %vm3494_vm1, %v3493_v6 }
 0x227   :  { %v221_v11 = vpop.f32.mrf.mxu1 }
 0x228   :  { %v302_v12 = vmul.f32 0.5, %v221_v11 }
 0x229   :  { %v3134_v13 = vpop.f32.mrf.mxu1 }
 0x22a   :  { %v305_v14 = vsel %vm304_vm3, %v302_v12, -inf }
 0x22b   :  { %306 = vmax.xlane.f32.xlu1 %v305_v14  ;;  %v298_v15 = vpop.f32.mrf.mxu1 }
 0x22c   :  { %v303_v16 = vmul.f32 0.5, %v298_v15 }
 0x22d   :  { %v3139_v17 = vpop.f32.mrf.mxu1 }
 0x22e   :  { %v308_v18 = vsel %vm304_vm3, %v303_v16, -inf }
 0x22f   :  { %309 = vmax.xlane.f32.xlu1 %v308_v18 }
 0x240   :  { %327 = vrot.lane.b32.xlu1 %v3578_v8, %s3496_s2 }
 0x244   :  { %403 = vrot.lane.b32.xlu1 %v3576_v7, %s3496_s2  ;;  %s3523_s2 = smov 28  }
 0x248   :  { %481 = vrot.lane.b32.xlu1 %v3578_v8, %s3497_s5 }
 0x24c   :  { %559 = vrot.lane.b32.xlu1 %v3576_v7, %s3497_s5 }
 0x2b4   :  { %v307_v19 = vpop.xlane.xlu1 %306 }
 0x2b5   :  { %v311_v20 = vsub.f32 %v302_v12, %v307_v19 }
 0x2b7   :  { %v313_v21 = vmul.f32 1.442695, %v311_v20 }
 0x2b8   :  { %v310_v22 = vpop.xlane.xlu1 %309 }
 0x2b9   :  { %3338 = vpow2.f32 %v313_v21  ;;  %v312_v23 = vsub.f32 %v303_v16, %v310_v22 }
 0x2bb   :  { %v315_v24 = vmul.f32 1.442695, %v312_v23 }
 0x2bc   :  { %v328_v25 = vpop.permute.xlu1 %327 }
 0x2bd   :  { %3340 = vpow2.f32 %v315_v24  ;;  %3141 = vmatpush3.msra.mxu1 %v328_v25 }
 0x2be   :  { %3145 = vmatprep.subr.mxu1 %v3493_v6 }
 0x2c0   :  { %v404_v26 = vpop.permute.xlu1 %403 }
 0x2c4   :  { %v482_v27 = vpop.permute.xlu1 %481 }
 0x2c5   :  { %3151 = vmatpush3.xpose.msk.msra.mxu0 %vm150_vm2, %v482_v27 }
 0x2c6   :  { %v3339_v28 = vpop.eup %3338  ;;  %3160 = vmatprep.subr.mxu0 %v3493_v6 }
 0x2c7   :  { %v317_v29 = vsel %vm304_vm3, %v3339_v28, 0.0 }
 0x2c8   :  { %318 = vadd.xlane.f32.xlu0 %v317_v29  ;;  %v560_v32 = vpop.permute.xlu1 %559 }
 0x2ca   :  { %v3341_v30 = vpop.eup %3340 }
 0x2cb   :  { %v320_v31 = vsel %vm304_vm3, %v3341_v30, 0.0 }
 0x2cc   :  { %321 = vadd.xlane.f32.xlu1 %v320_v31 }
 0x2dd   :  { %557 = vrot.lane.b32.xlu1 %v3576_v7, %s3498_s6 }
 0x2de   :  { %479 = vrot.lane.b32.xlu0 %v3578_v8, %s3498_s6 }
 0x351   :  { %v319_v33 = vpop.xlane.xlu0 %318 }
 0x352   :  { %3342 = vrcp.f32 %v319_v33 }
 0x355   :  { %v322_v34 = vpop.xlane.xlu1 %321  ;;  %v480_v35 = vpop.permute.xlu0 %479 }
 0x356   :  { %3344 = vrcp.f32 %v322_v34  ;;  %3153 = vmatmul.mubr.msk.f32.vlgmr.msra.gmra.mxu0 %vm150_vm2, %v480_v35 }
 0x357   :  { %3162 = vmatprep.mubr.msk.f32.mxu0 %vm3494_vm1, %v3493_v6 }
 0x359   :  { %v558_v40 = vpop.permute.xlu1 %557 }
 0x35f   :  { %v3343_v36 = vpop.eup %3342 }
 0x360   :  { %v325_v37 = vmul.f32 %v3343_v36, %v3339_v28 }
 0x362   :  { %3143 = vmatmul.mubr.msk.f32.vlgmr.msra.gmra.mxu1 %vm304_vm3, %v325_v37 }
 0x363   :  { %v3345_v38 = vpop.eup %3344  ;;  %3146 = vmatpush3.msra.mxu1 %v404_v26  ;;  %3147 = vmatprep.mubr.msk.f32.mxu1 %vm3494_vm1, %v3493_v6 }
 0x364   :  { %3155 = vmatprep.subr.mxu1 %v3493_v6  ;;  %v326_v39 = vmul.f32 %v3345_v38, %v3341_v30 }
 0x366   :  { %3148 = vmatmul.mubr.msk.f32.vlgmr.msra.gmra.mxu1 %vm304_vm3, %v326_v39 }
 0x367   :  { %3156 = vmatpush3.xpose.msk.msra.mxu1 %vm150_vm2, %v560_v32  ;;  %3157 = vmatprep.mubr.msk.f32.mxu1 %vm3494_vm1, %v3493_v6 }
 0x368   :  { %3165 = vmatprep.subr.mxu1 %v3493_v6 }
 0x36a   :  { %3158 = vmatmul.mubr.msk.f32.vlgmr.msra.gmra.mxu1 %vm150_vm2, %v558_v40 }
 0x36b   :  { %3167 = vmatprep.mubr.msk.f32.mxu1 %vm3494_vm1, %v3493_v6 }
 0x416   :  { %v553_v41 = vpop.f32.mrf.mxu0 }
 0x417   :  { %v635_v42 = vmul.f32 0.5, %v553_v41 }
 0x418   :  { %v3154_v43 = vpop.f32.mrf.mxu0 }
 0x419   :  { %v637_v44 = vsel %vm304_vm3, %v635_v42, -inf }
 0x41a   :  { %638 = vmax.xlane.f32.xlu1 %v637_v44 }
 0x422   :  { %v3623_v45 = vpop.f32.mrf.mxu1 }
 0x424   :  { %v3144_v46 = vpop.f32.mrf.mxu1 }
 0x426   :  { %v3625_v47 = vpop.f32.mrf.mxu1 }
 0x428   :  { %v3149_v48 = vpop.f32.mrf.mxu1 }
 0x42a   :  { %v631_v49 = vpop.f32.mrf.mxu1 }
 0x42b   :  { %v636_v50 = vmul.f32 0.5, %v631_v49 }
 0x42c   :  { %v3159_v51 = vpop.f32.mrf.mxu1 }
 0x42d   :  { %v640_v52 = vsel %vm304_vm3, %v636_v50, -inf }
 0x42e   :  { %641 = vmax.xlane.f32.xlu0 %v640_v52 }
 0x444   :  { %735 = vrot.lane.b32.xlu0 %v3576_v7, %s3499_s7 }
 0x448   :  { %811 = vrot.lane.b32.xlu0 %v3578_v8, %s3500_s8 }
 0x4a3   :  { %v639_v53 = vpop.xlane.xlu1 %638 }
 0x4a4   :  { %v643_v54 = vsub.f32 %v635_v42, %v639_v53 }
 0x4a6   :  { %v645_v55 = vmul.f32 1.442695, %v643_v54 }
 0x4a8   :  { %3346 = vpow2.f32 %v645_v55 }
 0x4b5   :  { %v3347_v56 = vpop.eup %3346 }
 0x4b6   :  { %v649_v57 = vsel %vm304_vm3, %v3347_v56, 0.0 }
 0x4b7   :  { %650 = vadd.xlane.f32.xlu1 %v649_v57  ;;  %v642_v58 = vpop.xlane.xlu0 %641 }
 0x4b8   :  { %v644_v60 = vsub.f32 %v636_v50, %v642_v58 }
 0x4ba   :  { %v647_v61 = vmul.f32 1.442695, %v644_v60 }
 0x4bb   :  { %v736_v59 = vpop.permute.xlu0 %735 }
 0x4bc   :  { %3166 = vmatpush3.msra.mxu1 %v736_v59  ;;  %3348 = vpow2.f32 %v647_v61 }
 0x4bd   :  { %3175 = vmatprep.subr.mxu1 %v3493_v6 }
 0x4bf   :  { %v812_v5 = vpop.permute.xlu0 %811 }
 0x4c8   :  { %659 = vrot.lane.b32.xlu1 %v3578_v8, %s3499_s7  ;;  %s3524_s7 = smov [#allocation8]  }
 0x4c9   :  { %v3349_v62 = vpop.eup %3348 }
 0x4ca   :  { %v652_v63 = vsel %vm304_vm3, %v3349_v62, 0.0 }
 0x4cc   :  { %813 = vrot.lane.b32.xlu1 %v3578_v8, %s3501_s9 }
 0x4d0   :  { %891 = vrot.lane.b32.xlu1 %v3576_v7, %s3501_s9 }
 0x4f4   :  { %653 = vadd.xlane.f32.xlu1 %v652_v63 }
 0x505   :  { %889 = vrot.lane.b32.xlu1 %v3576_v7, %s3500_s8  ;;  %s2977_s8 = sshll.u32 %s3524_s7, 4  ;;  %s2978_s8 = int_to_ptr.vmem [resolvable:$true] %s2977_s8 }
 0x506   :  { %s3462_s9 = scalar_lea.vmem %s2978_s8, 256  ;;  %p3467_p2 = scmp.lt.s32.totalorder %s2978_s8, %s2978_s8 }
 0x507   :  { %p3463_p1 = scmp.ne.s32.totalorder %s2978_s8, %s3462_s9  ;;  %p3468_p3 = scmp.lt.s32.totalorder %s3462_s9, %s3462_s9 }
 0x509   :  { %p3469_p4 = por %p3468_p3, %p3467_p2 }
 0x50b   :  { %p3470_p5 = pnand %p3469_p4, %p3463_p1 }
 0x540   :  { %v651_v0 = vpop.xlane.xlu1 %650 }
 0x541   :  { %3350 = vrcp.f32 %v651_v0 }
 0x544   :  { %v660_v1 = vpop.permute.xlu1 %659 }
 0x545   :  { %3161 = vmatpush3.msra.mxu0 %v660_v1 }
 0x546   :  { %3170 = vmatprep.subr.mxu0 %v3493_v6 }
 0x548   :  { %v814_v4 = vpop.permute.xlu1 %813 }
 0x54c   :  { %v892_v9 = vpop.permute.xlu1 %891 }
 0x54e   :  { %v3351_v2 = vpop.eup %3350 }
 0x54f   :  { %v657_v3 = vmul.f32 %v3351_v2, %v3347_v56 }
 0x551   :  { %3163 = vmatmul.mubr.msk.f32.vlgmr.msra.gmra.mxu0 %vm304_vm3, %v657_v3 }
 0x552   :  { %3171 = vmatpush3.xpose.msk.msra.mxu0 %vm150_vm2, %v814_v4  ;;  %3172 = vmatprep.mubr.msk.f32.mxu0 %vm3494_vm1, %v3493_v6 }
 0x553   :  { %3180 = vmatprep.subr.mxu0 %v3493_v6 }
 0x555   :  { %3173 = vmatmul.mubr.msk.f32.vlgmr.msra.gmra.mxu0 %vm150_vm2, %v812_v5 }
 0x556   :  { %3182 = vmatprep.mubr.msk.f32.mxu0 %vm3494_vm1, %v3493_v6 }
 0x57d   :  { %v654_v10 = vpop.xlane.xlu1 %653 }
 0x57e   :  { %3352 = vrcp.f32 %v654_v10 }
 0x581   :  { %v890_v13 = vpop.permute.xlu1 %889 }
 0x58b   :  { %v3353_v11 = vpop.eup %3352 }
 0x58c   :  { %v658_v12 = vmul.f32 %v3353_v11, %v3349_v62 }
 0x58e   :  { %3168 = vmatmul.mubr.msk.f32.vlgmr.msra.gmra.mxu1 %vm304_vm3, %v658_v12 }
 0x58f   :  { %3176 = vmatpush3.xpose.msk.msra.mxu1 %vm150_vm2, %v892_v9  ;;  %3177 = vmatprep.mubr.msk.f32.mxu1 %vm3494_vm1, %v3493_v6 }
 0x590   :  { %3185 = vmatprep.subr.mxu1 %v3493_v6 }
 0x592   :  { %3178 = vmatmul.mubr.msk.f32.vlgmr.msra.gmra.mxu1 %vm150_vm2, %v890_v13 }
 0x593   :  { %3187 = vmatprep.mubr.msk.f32.mxu1 %vm3494_vm1, %v3493_v6 }
 0x611   :  { %v3654_v14 = vpop.f32.mrf.mxu0 }
 0x613   :  { %v3164_v15 = vpop.f32.mrf.mxu0 }
 0x615   :  { %v885_v16 = vpop.f32.mrf.mxu0 }
 0x616   :  { %v967_v17 = vmul.f32 0.5, %v885_v16 }
 0x617   :  { %v3174_v18 = vpop.f32.mrf.mxu0 }
 0x618   :  { %v969_v19 = vsel %vm304_vm3, %v967_v17, -inf }
 0x619   :  { %970 = vmax.xlane.f32.xlu0 %v969_v19 }
 0x64e   :  { %v3657_v20 = vpop.f32.mrf.mxu1 }
 0x650   :  { %v3169_v21 = vpop.f32.mrf.mxu1 }
 0x652   :  { %v963_v22 = vpop.f32.mrf.mxu1 }
 0x653   :  { %v968_v23 = vmul.f32 0.5, %v963_v22 }
 0x654   :  { %v3179_v24 = vpop.f32.mrf.mxu1 }
 0x655   :  { %v972_v25 = vsel %vm304_vm3, %v968_v23, -inf }
 0x656   :  { %973 = vmax.xlane.f32.xlu1 %v972_v25 }
 0x667   :  { %991 = vrot.lane.b32.xlu1 %v3578_v8, %s3502_s10 }
 0x66b   :  { %1145 = vrot.lane.b32.xlu1 %v3578_v8, %s3503_s11 }
 0x66f   :  { %1223 = vrot.lane.b32.xlu1 %v3576_v7, %s3503_s11 }
 0x673   :  { %1221 = vrot.lane.b32.xlu1 %v3576_v7, %s3504_s12 }
 0x6a2   :  { %v971_v26 = vpop.xlane.xlu0 %970 }
 0x6a3   :  { %v975_v27 = vsub.f32 %v967_v17, %v971_v26 }
 0x6a5   :  { %v977_v28 = vmul.f32 1.442695, %v975_v27 }
 0x6a7   :  { %3354 = vpow2.f32 %v977_v28 }
 0x6b4   :  { %v3355_v29 = vpop.eup %3354 }
 0x6b5   :  { %v981_v30 = vsel %vm304_vm3, %v3355_v29, 0.0 }
 0x6b6   :  { %982 = vadd.xlane.f32.xlu0 %v981_v30 }
 0x6cc   :  { %1067 = vrot.lane.b32.xlu0 %v3576_v7, %s3502_s10 }
 0x6df   :  { %v974_v31 = vpop.xlane.xlu1 %973 }
 0x6e0   :  { %v976_v32 = vsub.f32 %v968_v23, %v974_v31 }
 0x6e2   :  { %v979_v33 = vmul.f32 1.442695, %v976_v32 }
 0x6e3   :  { %v992_v34 = vpop.permute.xlu1 %991 }
 0x6e4   :  { %3356 = vpow2.f32 %v979_v33  ;;  %3181 = vmatpush3.msra.mxu0 %v992_v34 }
 0x6e5   :  { %3190 = vmatprep.subr.mxu0 %v3493_v6 }
 0x6e7   :  { %v1146_v41 = vpop.permute.xlu1 %1145 }
 0x6eb   :  { %v1224_v46 = vpop.permute.xlu1 %1223 }
 0x6ef   :  { %v1222_v49 = vpop.permute.xlu1 %1221 }
 0x6f1   :  { %v3357_v35 = vpop.eup %3356 }
 0x6f2   :  { %v984_v36 = vsel %vm304_vm3, %v3357_v35, 0.0 }
 0x6f3   :  { %985 = vadd.xlane.f32.xlu0 %v984_v36 }
 0x709   :  { %1143 = vrot.lane.b32.xlu0 %v3578_v8, %s3504_s12 }
 0x73f   :  { %v983_v37 = vpop.xlane.xlu0 %982 }
 0x740   :  { %3358 = vrcp.f32 %v983_v37 }
 0x743   :  { %v1068_v38 = vpop.permute.xlu0 %1067 }
 0x744   :  { %3186 = vmatpush3.msra.mxu1 %v1068_v38 }
 0x745   :  { %3195 = vmatprep.subr.mxu1 %v3493_v6 }
 0x74d   :  { %v3359_v39 = vpop.eup %3358 }
 0x74e   :  { %v989_v40 = vmul.f32 %v3359_v39, %v3355_v29 }
 0x750   :  { %3183 = vmatmul.mubr.msk.f32.vlgmr.msra.gmra.mxu0 %vm304_vm3, %v989_v40 }
 0x751   :  { %3191 = vmatpush3.xpose.msk.msra.mxu0 %vm150_vm2, %v1146_v41  ;;  %3192 = vmatprep.mubr.msk.f32.mxu0 %vm3494_vm1, %v3493_v6 }
 0x752   :  { %3200 = vmatprep.subr.mxu0 %v3493_v6 }
 0x77c   :  { %v986_v42 = vpop.xlane.xlu0 %985 }
 0x77d   :  { %3360 = vrcp.f32 %v986_v42 }
 0x780   :  { %v1144_v43 = vpop.permute.xlu0 %1143 }
 0x781   :  { %3193 = vmatmul.mubr.msk.f32.vlgmr.msra.gmra.mxu0 %vm150_vm2, %v1144_v43 }
 0x782   :  { %3202 = vmatprep.mubr.msk.f32.mxu0 %vm3494_vm1, %v3493_v6 }
 0x78a   :  { %v3361_v44 = vpop.eup %3360 }
 0x78b   :  { %v990_v48 = vmul.f32 %v3361_v44, %v3357_v35 }
 0x78d   :  { %3188 = vmatmul.mubr.msk.f32.vlgmr.msra.gmra.mxu1 %vm304_vm3, %v990_v48 }
 0x78e   :  { %3196 = vmatpush3.xpose.msk.msra.mxu1 %vm150_vm2, %v1224_v46  ;;  %3197 = vmatprep.mubr.msk.f32.mxu1 %vm3494_vm1, %v3493_v6 }
 0x78f   :  { %3205 = vmatprep.subr.mxu1 %v3493_v6 }
 0x791   :  { %3198 = vmatmul.mubr.msk.f32.vlgmr.msra.gmra.mxu1 %vm150_vm2, %v1222_v49 }
 0x792   :  { %3207 = vmatprep.mubr.msk.f32.mxu1 %vm3494_vm1, %v3493_v6 }
 0x810   :  { %v3686_v50 = vpop.f32.mrf.mxu0 }
 0x812   :  { %v3184_v51 = vpop.f32.mrf.mxu0 }
 0x841   :  { %v1217_v52 = vpop.f32.mrf.mxu0 }
 0x842   :  { %v1299_v53 = vmul.f32 0.5, %v1217_v52 }
 0x843   :  { %v3194_v54 = vpop.f32.mrf.mxu0 }
 0x844   :  { %v1301_v55 = vsel %vm304_vm3, %v1299_v53, -inf }
 0x845   :  { %1302 = vmax.xlane.f32.xlu0 %v1301_v55 }
 0x84d   :  { %v3689_v56 = vpop.f32.mrf.mxu1 }
 0x84f   :  { %v3189_v57 = vpop.f32.mrf.mxu1 }
 0x851   :  { %v1295_v58 = vpop.f32.mrf.mxu1 }
 0x852   :  { %v1300_v59 = vmul.f32 0.5, %v1295_v58 }
 0x853   :  { %v3199_v60 = vpop.f32.mrf.mxu1 }
 0x854   :  { %v1304_v61 = vsel %vm304_vm3, %v1300_v59, -inf }
 0x855   :  { %1305 = vmax.xlane.f32.xlu1 %v1304_v61 }
 0x866   :  { %1323 = vrot.lane.b32.xlu1 %v3578_v8, %s3505_s13 }
 0x86a   :  { %1477 = vrot.lane.b32.xlu1 %v3578_v8, %s3506_s14 }
 0x86e   :  { %1555 = vrot.lane.b32.xlu1 %v3576_v7, %s3506_s14 }
 0x872   :  { %1553 = vrot.lane.b32.xlu1 %v3576_v7, %s3507_s15 }
 0x8ce   :  { %v1303_v62 = vpop.xlane.xlu0 %1302 }
 0x8cf   :  { %v1307_v63 = vsub.f32 %v1299_v53, %v1303_v62 }
 0x8d1   :  { %v1309_v0 = vmul.f32 1.442695, %v1307_v63 }
 0x8d3   :  { %3362 = vpow2.f32 %v1309_v0 }
 0x8de   :  { %v1306_v1 = vpop.xlane.xlu1 %1305 }
 0x8df   :  { %v1308_v5 = vsub.f32 %v1300_v59, %v1306_v1 }
 0x8e0   :  { %v3363_v2 = vpop.eup %3362 }
 0x8e1   :  { %v1313_v3 = vsel %vm304_vm3, %v3363_v2, 0.0  ;;  %v1311_v9 = vmul.f32 1.442695, %v1308_v5 }
 0x8e2   :  { %v1324_v4 = vpop.permute.xlu1 %1323  ;;  %1314 = vadd.xlane.f32.xlu0 %v1313_v3 }
 0x8e3   :  { %3201 = vmatpush3.msra.mxu0 %v1324_v4  ;;  %3364 = vpow2.f32 %v1311_v9 }
 0x8e4   :  { %3210 = vmatprep.subr.mxu0 %v3493_v6 }
 0x8e6   :  { %v1478_v17 = vpop.permute.xlu1 %1477 }
 0x8ea   :  { %v1556_v22 = vpop.permute.xlu1 %1555 }
 0x8ee   :  { %v1554_v24 = vpop.permute.xlu1 %1553 }
 0x8f0   :  { %v3365_v10 = vpop.eup %3364 }
 0x8f1   :  { %v1316_v11 = vsel %vm304_vm3, %v3365_v10, 0.0 }
 0x8f8   :  { %1399 = vrot.lane.b32.xlu0 %v3576_v7, %s3505_s13 }
 0x917   :  { %1317 = vadd.xlane.f32.xlu0 %v1316_v11 }
 0x92d   :  { %1475 = vrot.lane.b32.xlu0 %v3578_v8, %s3507_s15 }
 0x96b   :  { %v1315_v12 = vpop.xlane.xlu0 %1314 }
 0x96c   :  { %3366 = vrcp.f32 %v1315_v12 }
 0x96f   :  { %v1400_v13 = vpop.permute.xlu0 %1399 }
 0x970   :  { %3206 = vmatpush3.msra.mxu1 %v1400_v13 }
 0x971   :  { %3215 = vmatprep.subr.mxu1 %v3493_v6 }
 0x979   :  { %v3367_v15 = vpop.eup %3366 }
 0x97a   :  { %v1321_v16 = vmul.f32 %v3367_v15, %v3363_v2 }
 0x97c   :  { %3203 = vmatmul.mubr.msk.f32.vlgmr.msra.gmra.mxu0 %vm304_vm3, %v1321_v16 }
 0x97d   :  { %3211 = vmatpush3.xpose.msk.msra.mxu0 %vm150_vm2, %v1478_v17  ;;  %3212 = vmatprep.mubr.msk.f32.mxu0 %vm3494_vm1, %v3493_v6 }
 0x97e   :  { %3220 = vmatprep.subr.mxu0 %v3493_v6 }
 0x9a0   :  { %v1318_v18 = vpop.xlane.xlu0 %1317 }
 0x9a1   :  { %3368 = vrcp.f32 %v1318_v18 }
 0x9a4   :  { %v1476_v19 = vpop.permute.xlu0 %1475 }
 0x9a5   :  { %3213 = vmatmul.mubr.msk.f32.vlgmr.msra.gmra.mxu0 %vm150_vm2, %v1476_v19 }
 0x9a6   :  { %3222 = vmatprep.mubr.msk.f32.mxu0 %vm3494_vm1, %v3493_v6 }
 0x9ae   :  { %v3369_v21 = vpop.eup %3368 }
 0x9af   :  { %v1322_v23 = vmul.f32 %v3369_v21, %v3365_v10 }
 0x9b1   :  { %3208 = vmatmul.mubr.msk.f32.vlgmr.msra.gmra.mxu1 %vm304_vm3, %v1322_v23 }
 0x9b2   :  { %3216 = vmatpush3.xpose.msk.msra.mxu1 %vm150_vm2, %v1556_v22  ;;  %3217 = vmatprep.mubr.msk.f32.mxu1 %vm3494_vm1, %v3493_v6 }
 0x9b3   :  { %3225 = vmatprep.subr.mxu1 %v3493_v6 }
 0x9b5   :  { %3218 = vmatmul.mubr.msk.f32.vlgmr.msra.gmra.mxu1 %vm150_vm2, %v1554_v24 }
 0x9b6   :  { %3227 = vmatprep.mubr.msk.f32.mxu1 %vm3494_vm1, %v3493_v6 }
 0xa3c   :  { %v3718_v25 = vpop.f32.mrf.mxu0 }
 0xa3e   :  { %v3204_v26 = vpop.f32.mrf.mxu0 }
 0xa65   :  { %v1549_v27 = vpop.f32.mrf.mxu0 }
 0xa66   :  { %v1631_v28 = vmul.f32 0.5, %v1549_v27 }
 0xa67   :  { %v3214_v29 = vpop.f32.mrf.mxu0 }
 0xa68   :  { %v1633_v30 = vsel %vm304_vm3, %v1631_v28, -inf }
 0xa69   :  { %1634 = vmax.xlane.f32.xlu0 %v1633_v30 }
 0xa71   :  { %v3721_v31 = vpop.f32.mrf.mxu1 }
 0xa73   :  { %v3209_v32 = vpop.f32.mrf.mxu1 }
 0xa75   :  { %v1627_v33 = vpop.f32.mrf.mxu1 }
 0xa76   :  { %v1632_v34 = vmul.f32 0.5, %v1627_v33 }
 0xa77   :  { %v3219_v35 = vpop.f32.mrf.mxu1 }
 0xa78   :  { %v1636_v36 = vsel %vm304_vm3, %v1632_v34, -inf }
 0xa79   :  { %1637 = vmax.xlane.f32.xlu1 %v1636_v36 }
 0xa8a   :  { %1655 = vrot.lane.b32.xlu1 %v3578_v8, %s3508_s16 }
 0xa8e   :  { %1809 = vrot.lane.b32.xlu1 %v3578_v8, %s3509_s17 }
 0xa92   :  { %1887 = vrot.lane.b32.xlu1 %v3576_v7, %s3509_s17 }
 0xa96   :  { %1885 = vrot.lane.b32.xlu1 %v3576_v7, %s3510_s18 }
 0xaf2   :  { %v1635_v37 = vpop.xlane.xlu0 %1634 }
 0xaf3   :  { %v1639_v38 = vsub.f32 %v1631_v28, %v1635_v37 }
 0xaf5   :  { %v1641_v39 = vmul.f32 1.442695, %v1639_v38 }
 0xaf7   :  { %3370 = vpow2.f32 %v1641_v39 }
 0xb02   :  { %v1638_v40 = vpop.xlane.xlu1 %1637 }
 0xb03   :  { %v1640_v44 = vsub.f32 %v1632_v34, %v1638_v40 }
 0xb04   :  { %v3371_v41 = vpop.eup %3370 }
 0xb05   :  { %v1645_v42 = vsel %vm304_vm3, %v3371_v41, 0.0  ;;  %v1643_v46 = vmul.f32 1.442695, %v1640_v44 }
 0xb06   :  { %v1656_v43 = vpop.permute.xlu1 %1655  ;;  %1646 = vadd.xlane.f32.xlu0 %v1645_v42 }
 0xb07   :  { %3221 = vmatpush3.msra.mxu0 %v1656_v43  ;;  %3372 = vpow2.f32 %v1643_v46 }
 0xb08   :  { %3230 = vmatprep.subr.mxu0 %v3493_v6 }
 0xb0a   :  { %v1810_v55 = vpop.permute.xlu1 %1809 }
 0xb0e   :  { %v1888_v60 = vpop.permute.xlu1 %1887 }
 0xb12   :  { %v1886_v62 = vpop.permute.xlu1 %1885 }
 0xb14   :  { %v3373_v48 = vpop.eup %3372 }
 0xb15   :  { %v1648_v49 = vsel %vm304_vm3, %v3373_v48, 0.0 }
 0xb1c   :  { %1731 = vrot.lane.b32.xlu0 %v3576_v7, %s3508_s16 }
 0xb3b   :  { %1649 = vadd.xlane.f32.xlu0 %v1648_v49 }
 0xb51   :  { %1807 = vrot.lane.b32.xlu0 %v3578_v8, %s3510_s18 }
 0xb8f   :  { %v1647_v51 = vpop.xlane.xlu0 %1646 }
 0xb90   :  { %3374 = vrcp.f32 %v1647_v51 }
 0xb93   :  { %v1732_v52 = vpop.permute.xlu0 %1731 }
 0xb94   :  { %3226 = vmatpush3.msra.mxu1 %v1732_v52 }
 0xb95   :  { %3235 = vmatprep.subr.mxu1 %v3493_v6 }
 0xb9d   :  { %v3375_v53 = vpop.eup %3374 }
 0xb9e   :  { %v1653_v54 = vmul.f32 %v3375_v53, %v3371_v41 }
 0xba0   :  { %3223 = vmatmul.mubr.msk.f32.vlgmr.msra.gmra.mxu0 %vm304_vm3, %v1653_v54 }
 0xba1   :  { %3231 = vmatpush3.xpose.msk.msra.mxu0 %vm150_vm2, %v1810_v55  ;;  %3232 = vmatprep.mubr.msk.f32.mxu0 %vm3494_vm1, %v3493_v6 }
 0xba2   :  { %3240 = vmatprep.subr.mxu0 %v3493_v6 }
 0xbc4   :  { %v1650_v57 = vpop.xlane.xlu0 %1649 }
 0xbc5   :  { %3376 = vrcp.f32 %v1650_v57 }
 0xbc8   :  { %v1808_v58 = vpop.permute.xlu0 %1807 }
 0xbc9   :  { %3233 = vmatmul.mubr.msk.f32.vlgmr.msra.gmra.mxu0 %vm150_vm2, %v1808_v58 }
 0xbca   :  { %3242 = vmatprep.mubr.msk.f32.mxu0 %vm3494_vm1, %v3493_v6 }
 0xbd2   :  { %v3377_v59 = vpop.eup %3376 }
 0xbd3   :  { %v1654_v61 = vmul.f32 %v3377_v59, %v3373_v48 }
 0xbd5   :  { %3228 = vmatmul.mubr.msk.f32.vlgmr.msra.gmra.mxu1 %vm304_vm3, %v1654_v61 }
 0xbd6   :  { %3236 = vmatpush3.xpose.msk.msra.mxu1 %vm150_vm2, %v1888_v60  ;;  %3237 = vmatprep.mubr.msk.f32.mxu1 %vm3494_vm1, %v3493_v6 }
 0xbd7   :  { %3245 = vmatprep.subr.mxu1 %v3493_v6 }
 0xbd9   :  { %3238 = vmatmul.mubr.msk.f32.vlgmr.msra.gmra.mxu1 %vm150_vm2, %v1886_v62 }
 0xbda   :  { %3247 = vmatprep.mubr.msk.f32.mxu1 %vm3494_vm1, %v3493_v6 }
 0xc60   :  { %v3750_v63 = vpop.f32.mrf.mxu0 }
 0xc62   :  { %v3224_v0 = vpop.f32.mrf.mxu0 }
 0xc89   :  { %v1881_v1 = vpop.f32.mrf.mxu0 }
 0xc8a   :  { %v1963_v2 = vmul.f32 0.5, %v1881_v1 }
 0xc8b   :  { %v3234_v3 = vpop.f32.mrf.mxu0 }
 0xc8c   :  { %v1965_v4 = vsel %vm304_vm3, %v1963_v2, -inf }
 0xc8d   :  { %1966 = vmax.xlane.f32.xlu0 %v1965_v4 }
 0xc95   :  { %v3753_v5 = vpop.f32.mrf.mxu1 }
 0xc97   :  { %v3229_v9 = vpop.f32.mrf.mxu1 }
 0xc99   :  { %v1959_v10 = vpop.f32.mrf.mxu1 }
 0xc9a   :  { %v1964_v11 = vmul.f32 0.5, %v1959_v10 }
 0xc9b   :  { %v3239_v12 = vpop.f32.mrf.mxu1 }
 0xc9c   :  { %v1968_v13 = vsel %vm304_vm3, %v1964_v11, -inf }
 0xc9d   :  { %1969 = vmax.xlane.f32.xlu1 %v1968_v13 }
 0xcae   :  { %1987 = vrot.lane.b32.xlu1 %v3578_v8, %s3511_s19 }
 0xcb2   :  { %2141 = vrot.lane.b32.xlu1 %v3578_v8, %s3512_s22 }
 0xcb6   :  { %2219 = vrot.lane.b32.xlu1 %v3576_v7, %s3512_s22 }
 0xcba   :  { %2217 = vrot.lane.b32.xlu1 %v3576_v7, %s3513_s23 }
 0xd16   :  { %v1967_v15 = vpop.xlane.xlu0 %1966 }
 0xd17   :  { %v1971_v16 = vsub.f32 %v1963_v2, %v1967_v15 }
 0xd19   :  { %v1973_v17 = vmul.f32 1.442695, %v1971_v16 }
 0xd1b   :  { %3378 = vpow2.f32 %v1973_v17 }
 0xd26   :  { %v1970_v18 = vpop.xlane.xlu1 %1969 }
 0xd27   :  { %v1972_v23 = vsub.f32 %v1964_v11, %v1970_v18 }
 0xd28   :  { %v3379_v19 = vpop.eup %3378 }
 0xd29   :  { %v1977_v21 = vsel %vm304_vm3, %v3379_v19, 0.0  ;;  %v1975_v24 = vmul.f32 1.442695, %v1972_v23 }
 0xd2a   :  { %v1988_v22 = vpop.permute.xlu1 %1987  ;;  %1978 = vadd.xlane.f32.xlu0 %v1977_v21 }
 0xd2b   :  { %3241 = vmatpush3.msra.mxu0 %v1988_v22  ;;  %3380 = vpow2.f32 %v1975_v24 }
 0xd2c   :  { %3250 = vmatprep.subr.mxu0 %v3493_v6 }
 0xd2e   :  { %v2142_v33 = vpop.permute.xlu1 %2141 }
 0xd32   :  { %v2220_v37 = vpop.permute.xlu1 %2219 }
 0xd36   :  { %v2218_v39 = vpop.permute.xlu1 %2217 }
 0xd38   :  { %v3381_v26 = vpop.eup %3380 }
 0xd39   :  { %v1980_v27 = vsel %vm304_vm3, %v3381_v26, 0.0 }
 0xd40   :  { %2063 = vrot.lane.b32.xlu0 %v3576_v7, %s3511_s19 }
 0xd5f   :  { %1981 = vadd.xlane.f32.xlu0 %v1980_v27 }
 0xd75   :  { %2139 = vrot.lane.b32.xlu0 %v3578_v8, %s3513_s23 }
 0xdb3   :  { %v1979_v28 = vpop.xlane.xlu0 %1978 }
 0xdb4   :  { %3382 = vrcp.f32 %v1979_v28 }
 0xdb7   :  { %v2064_v29 = vpop.permute.xlu0 %2063 }
 0xdb8   :  { %3246 = vmatpush3.msra.mxu1 %v2064_v29 }
 0xdb9   :  { %3255 = vmatprep.subr.mxu1 %v3493_v6 }
 0xdc1   :  { %v3383_v30 = vpop.eup %3382 }
 0xdc2   :  { %v1985_v32 = vmul.f32 %v3383_v30, %v3379_v19 }
 0xdc4   :  { %3243 = vmatmul.mubr.msk.f32.vlgmr.msra.gmra.mxu0 %vm304_vm3, %v1985_v32 }
 0xdc5   :  { %3251 = vmatpush3.xpose.msk.msra.mxu0 %vm150_vm2, %v2142_v33  ;;  %3252 = vmatprep.mubr.msk.f32.mxu0 %vm3494_vm1, %v3493_v6 }
 0xdc6   :  { %3260 = vmatprep.subr.mxu0 %v3493_v6 }
 0xde8   :  { %v1982_v34 = vpop.xlane.xlu0 %1981 }
 0xde9   :  { %3384 = vrcp.f32 %v1982_v34 }
 0xdec   :  { %v2140_v35 = vpop.permute.xlu0 %2139 }
 0xded   :  { %3253 = vmatmul.mubr.msk.f32.vlgmr.msra.gmra.mxu0 %vm150_vm2, %v2140_v35 }
 0xdee   :  { %3262 = vmatprep.mubr.msk.f32.mxu0 %vm3494_vm1, %v3493_v6 }
 0xdf6   :  { %v3385_v36 = vpop.eup %3384 }
 0xdf7   :  { %v1986_v38 = vmul.f32 %v3385_v36, %v3381_v26 }
 0xdf9   :  { %3248 = vmatmul.mubr.msk.f32.vlgmr.msra.gmra.mxu1 %vm304_vm3, %v1986_v38 }
 0xdfa   :  { %3256 = vmatpush3.xpose.msk.msra.mxu1 %vm150_vm2, %v2220_v37  ;;  %3257 = vmatprep.mubr.msk.f32.mxu1 %vm3494_vm1, %v3493_v6 }
 0xdfb   :  { %3265 = vmatprep.subr.mxu1 %v3493_v6 }
 0xdfd   :  { %3258 = vmatmul.mubr.msk.f32.vlgmr.msra.gmra.mxu1 %vm150_vm2, %v2218_v39 }
 0xdfe   :  { %3267 = vmatprep.mubr.msk.f32.mxu1 %vm3494_vm1, %v3493_v6 }
 0xe84   :  { %v3782_v40 = vpop.f32.mrf.mxu0 }
 0xe86   :  { %v3244_v41 = vpop.f32.mrf.mxu0 }
 0xead   :  { %v2213_v42 = vpop.f32.mrf.mxu0 }
 0xeae   :  { %v2295_v43 = vmul.f32 0.5, %v2213_v42 }
 0xeaf   :  { %v3254_v44 = vpop.f32.mrf.mxu0 }
 0xeb0   :  { %v2297_v46 = vsel %vm304_vm3, %v2295_v43, -inf }
 0xeb1   :  { %2298 = vmax.xlane.f32.xlu0 %v2297_v46 }
 0xeb9   :  { %v3785_v48 = vpop.f32.mrf.mxu1 }
 0xebb   :  { %v3249_v49 = vpop.f32.mrf.mxu1 }
 0xebd   :  { %v2291_v51 = vpop.f32.mrf.mxu1 }
 0xebe   :  { %v2296_v52 = vmul.f32 0.5, %v2291_v51 }
 0xebf   :  { %v3259_v53 = vpop.f32.mrf.mxu1 }
 0xec0   :  { %v2300_v54 = vsel %vm304_vm3, %v2296_v52, -inf }
 0xec1   :  { %2301 = vmax.xlane.f32.xlu1 %v2300_v54 }
 0xed2   :  { %2319 = vrot.lane.b32.xlu1 %v3578_v8, %s3514_s24 }
 0xed6   :  { %2473 = vrot.lane.b32.xlu1 %v3578_v8, %s3515_s25 }
 0xeda   :  { %2551 = vrot.lane.b32.xlu1 %v3576_v7, %s3515_s25 }
 0xede   :  { %2549 = vrot.lane.b32.xlu1 %v3576_v7, %s3516_s26 }
 0xf3a   :  { %v2299_v55 = vpop.xlane.xlu0 %2298 }
 0xf3b   :  { %v2303_v57 = vsub.f32 %v2295_v43, %v2299_v55 }
 0xf3d   :  { %v2305_v58 = vmul.f32 1.442695, %v2303_v57 }
 0xf3f   :  { %3386 = vpow2.f32 %v2305_v58 }
 0xf4a   :  { %v2302_v59 = vpop.xlane.xlu1 %2301 }
 0xf4b   :  { %v2304_v0 = vsub.f32 %v2296_v52, %v2302_v59 }
 0xf4c   :  { %v3387_v60 = vpop.eup %3386 }
 0xf4d   :  { %v2309_v61 = vsel %vm304_vm3, %v3387_v60, 0.0  ;;  %v2307_v1 = vmul.f32 1.442695, %v2304_v0 }
 0xf4e   :  { %v2320_v62 = vpop.permute.xlu1 %2319  ;;  %2310 = vadd.xlane.f32.xlu0 %v2309_v61 }
 0xf4f   :  { %3261 = vmatpush3.msra.mxu0 %v2320_v62  ;;  %3388 = vpow2.f32 %v2307_v1 }
 0xf50   :  { %3270 = vmatprep.subr.mxu0 %v3493_v6 }
 0xf52   :  { %v2474_v12 = vpop.permute.xlu1 %2473 }
 0xf56   :  { %v2552_v17 = vpop.permute.xlu1 %2551 }
 0xf5a   :  { %v2550_v19 = vpop.permute.xlu1 %2549 }
 0xf5c   :  { %v3389_v2 = vpop.eup %3388 }
 0xf5d   :  { %v2312_v3 = vsel %vm304_vm3, %v3389_v2, 0.0 }
 0xf64   :  { %2395 = vrot.lane.b32.xlu0 %v3576_v7, %s3514_s24 }
 0xf83   :  { %2313 = vadd.xlane.f32.xlu0 %v2312_v3 }
 0xf99   :  { %2471 = vrot.lane.b32.xlu0 %v3578_v8, %s3516_s26 }
 0xfd7   :  { %v2311_v4 = vpop.xlane.xlu0 %2310 }
 0xfd8   :  { %3390 = vrcp.f32 %v2311_v4 }
 0xfdb   :  { %v2396_v9 = vpop.permute.xlu0 %2395 }
 0xfdc   :  { %3266 = vmatpush3.msra.mxu1 %v2396_v9 }
 0xfdd   :  { %3275 = vmatprep.subr.mxu1 %v3493_v6 }
 0xfe5   :  { %v3391_v10 = vpop.eup %3390 }
 0xfe6   :  { %v2317_v11 = vmul.f32 %v3391_v10, %v3387_v60 }
 0xfe8   :  { %3263 = vmatmul.mubr.msk.f32.vlgmr.msra.gmra.mxu0 %vm304_vm3, %v2317_v11 }
 0xfe9   :  { %3271 = vmatpush3.xpose.msk.msra.mxu0 %vm150_vm2, %v2474_v12  ;;  %3272 = vmatprep.mubr.msk.f32.mxu0 %vm3494_vm1, %v3493_v6 }
 0xfea   :  { %3280 = vmatprep.subr.mxu0 %v3493_v6 }
0x100c   :  { %v2314_v13 = vpop.xlane.xlu0 %2313 }
0x100d   :  { %3392 = vrcp.f32 %v2314_v13 }
0x1010   :  { %v2472_v15 = vpop.permute.xlu0 %2471 }
0x1011   :  { %3273 = vmatmul.mubr.msk.f32.vlgmr.msra.gmra.mxu0 %vm150_vm2, %v2472_v15 }
0x1012   :  { %3282 = vmatprep.mubr.msk.f32.mxu0 %vm3494_vm1, %v3493_v6 }
0x101a   :  { %v3393_v16 = vpop.eup %3392 }
0x101b   :  { %v2318_v18 = vmul.f32 %v3393_v16, %v3389_v2 }
0x101d   :  { %3268 = vmatmul.mubr.msk.f32.vlgmr.msra.gmra.mxu1 %vm304_vm3, %v2318_v18 }
0x101e   :  { %3276 = vmatpush3.xpose.msk.msra.mxu1 %vm150_vm2, %v2552_v17  ;;  %3277 = vmatprep.mubr.msk.f32.mxu1 %vm3494_vm1, %v3493_v6 }
0x101f   :  { %3285 = vmatprep.subr.mxu1 %v3493_v6 }
0x1021   :  { %3278 = vmatmul.mubr.msk.f32.vlgmr.msra.gmra.mxu1 %vm150_vm2, %v2550_v19 }
0x1022   :  { %3287 = vmatprep.mubr.msk.f32.mxu1 %vm3494_vm1, %v3493_v6 }
0x10a8   :  { %v2391_v21 = vpop.f32.mrf.mxu0 }
0x10aa   :  { %v3264_v22 = vpop.f32.mrf.mxu0 }
0x10d1   :  { %v2545_v23 = vpop.f32.mrf.mxu0 }
0x10d2   :  { %v2627_v24 = vmul.f32 0.5, %v2545_v23 }
0x10d3   :  { %v3274_v26 = vpop.f32.mrf.mxu0 }
0x10d4   :  { %v2629_v27 = vsel %vm304_vm3, %v2627_v24, -inf }
0x10d5   :  { %2630 = vmax.xlane.f32.xlu0 %v2629_v27 }
0x10dd   :  { %v2467_v28 = vpop.f32.mrf.mxu1 }
0x10df   :  { %v3269_v29 = vpop.f32.mrf.mxu1 }
0x10e1   :  { %v2623_v30 = vpop.f32.mrf.mxu1 }
0x10e2   :  { %v2628_v32 = vmul.f32 0.5, %v2623_v30 }
0x10e3   :  { %v3279_v33 = vpop.f32.mrf.mxu1 }
0x10e4   :  { %v2632_v34 = vsel %vm304_vm3, %v2628_v32, -inf }
0x10e5   :  { %2633 = vmax.xlane.f32.xlu1 %v2632_v34 }
0x10f6   :  { %2651 = vrot.lane.b32.xlu1 %v3578_v8, %s3517_s27 }
0x10fa   :  { %2805 = vrot.lane.b32.xlu1 %v3654_v14, %s3518_s28 }
0x10fe   :  { %2807 = vrot.lane.b32.xlu1 %v3657_v20, %s3518_s28 }
0x1102   :  { %2815 = vrot.lane.b32.xlu1 %v3689_v56, %s3491_s21 }
0x1106   :  { %2823 = vrot.lane.b32.xlu1 %v3721_v31, %s3519_s29 }
0x110a   :  { %2831 = vrot.lane.b32.xlu1 %v3753_v5, %s3520_s1 }
0x110e   :  { %2839 = vrot.lane.b32.xlu1 %v3785_v48, %s3521_s30 }
0x1112   :  { %2847 = vrot.lane.b32.xlu1 %v2467_v28, %s3522_s0 }
0x115e   :  { %v2631_v6 = vpop.xlane.xlu0 %2630 }
0x115f   :  { %v2635_v8 = vsub.f32 %v2627_v24, %v2631_v6  ;;  %v3040_v24 = vld [vmem:[%s3864_s3] ss:$0 sm:$0xff] }
0x1161   :  { %v2637_v35 = vmul.f32 1.442695, %v2635_v8 }
0x1163   :  { %3394 = vpow2.f32 %v2637_v35 }
0x116e   :  { %v2634_v14 = vpop.xlane.xlu1 %2633 }
0x116f   :  { %v2636_v20 = vsub.f32 %v2628_v32, %v2634_v14 }
0x1170   :  { %v3395_v36 = vpop.eup %3394 }
0x1171   :  { %v2639_v37 = vmul.f32 1.442695, %v2636_v20  ;;  %v2641_v56 = vsel %vm304_vm3, %v3395_v36, 0.0 }
0x1172   :  { %v2652_v38 = vpop.permute.xlu1 %2651  ;;  %2642 = vadd.xlane.f32.xlu0 %v2641_v56 }
0x1173   :  { %3396 = vpow2.f32 %v2639_v37  ;;  %3281 = vmatpush3.msra.mxu0 %v2652_v38 }
0x1176   :  { %v2806_v54 = vpop.permute.xlu1 %2805 }
0x1177   :  { %v2859_v62 = vsel %vm150_vm2, %v3623_v45, %v2806_v54 }
0x117a   :  { %v2808_v57 = vpop.permute.xlu1 %2807 }
0x117b   :  { %v2860_v13 = vsel %vm150_vm2, %v3625_v47, %v2808_v57 }
0x117e   :  { %v2816_v59 = vpop.permute.xlu1 %2815 }
0x117f   :  { %v2862_v15 = vsel %vm304_vm3, %v2860_v13, %v2816_v59 }
0x1180   :  { %v3397_v31 = vpop.eup %3396 }
0x1181   :  { %v2644_v5 = vsel %vm304_vm3, %v3397_v31, 0.0 }
0x1182   :  { %2645 = vadd.xlane.f32.xlu0 %v2644_v5  ;;  %v2824_v61 = vpop.permute.xlu1 %2823 }
0x1183   :  { %v2865_v17 = vsel %vm2863_vm4, %v2862_v15, %v2824_v61 }
0x1186   :  { %v2832_v9 = vpop.permute.xlu1 %2831 }
0x1187   :  { %v2868_v18 = vsel %vm2866_vm5, %v2865_v17, %v2832_v9 }
0x118a   :  { %v2840_v45 = vpop.permute.xlu1 %2839 }
0x118b   :  { %v2871_v19 = vsel %vm2869_vm6, %v2868_v18, %v2840_v45 }
0x118e   :  { %v2848_v16 = vpop.permute.xlu1 %2847 }
0x1198   :  { %2727 = vrot.lane.b32.xlu0 %v3576_v7, %s3517_s27 }
0x119c   :  { %2813 = vrot.lane.b32.xlu0 %v3686_v50, %s3491_s21  ;;  %v2881_v50 = vld [vmem:[#allocation7 + $0x18] sm:$0xff] }
0x119d   :  { %3290 = vmatprep.subr.mxu0 %v2881_v50 }
0x11a0   :  { %2821 = vrot.lane.b32.xlu0 %v3718_v25, %s3519_s29  ;;  %v2880_v25 = vld [vmem:[#allocation7 + $0x10] sm:$0xff] }
0x11a4   :  { %2829 = vrot.lane.b32.xlu0 %v3750_v63, %s3520_s1  ;;  %v2879_v63 = vld [vmem:[#allocation7 + $0x8] sm:$0xff] }
0x11a8   :  { %2837 = vrot.lane.b32.xlu0 %v3782_v40, %s3521_s30  ;;  %v2878_v40 = vld [vmem:[#allocation7] sm:$0xff] }
0x11ac   :  { %2845 = vrot.lane.b32.xlu0 %v2391_v21, %s3522_s0  ;;  %v2874_v21 = vsel %vm2872_vm8, %v2871_v19, %v2848_v16 }
0x11fb   :  { %v2643_v39 = vpop.xlane.xlu0 %2642 }
0x11fc   :  { %3398 = vrcp.f32 %v2643_v39 }
0x1209   :  { %v3399_v41 = vpop.eup %3398 }
0x120a   :  { %v2649_v42 = vmul.f32 %v3399_v41, %v3395_v36 }
0x120b   :  { %v2646_v43 = vpop.xlane.xlu0 %2645 }
0x120c   :  { %3400 = vrcp.f32 %v2646_v43  ;;  %3283 = vmatmul.mubr.msk.f32.vlgmr.msra.gmra.mxu0 %vm304_vm3, %v2649_v42 }
0x120d   :  { %3291 = vmatpush3.msra.mxu0 %v2881_v50 }
0x120e   :  { %3292 = vmatprep.subr.mxu0 %v2880_v25 }
0x120f   :  { %v2728_v44 = vpop.permute.xlu0 %2727  ;;  %3293 = vmatpush3.msra.mxu0 %v2880_v25 }
0x1210   :  { %3286 = vmatpush3.msra.mxu1 %v2728_v44  ;;  %3294 = vmatprep.subr.mxu0 %v2879_v63 }
0x1211   :  { %3295 = vmatpush3.msra.mxu0 %v2879_v63 }
0x1212   :  { %3296 = vmatprep.subr.mxu0 %v2878_v40 }
0x1213   :  { %3297 = vmatpush3.msra.mxu0 %v2878_v40  ;;  %v2814_v53 = vpop.permute.xlu0 %2813 }
0x1214   :  { %v2861_v0 = vsel %vm304_vm3, %v2859_v62, %v2814_v53 }
0x1217   :  { %v2822_v55 = vpop.permute.xlu0 %2821 }
0x1218   :  { %v2864_v2 = vsel %vm2863_vm4, %v2861_v0, %v2822_v55 }
0x1219   :  { %v3401_v7 = vpop.eup %3400 }
0x121a   :  { %v2650_v46 = vmul.f32 %v3401_v7, %v3397_v31 }
0x121b   :  { %v2830_v58 = vpop.permute.xlu0 %2829 }
0x121c   :  { %3288 = vmatmul.mubr.msk.f32.vlgmr.msra.gmra.mxu1 %vm304_vm3, %v2650_v46  ;;  %v2867_v3 = vsel %vm2866_vm5, %v2864_v2, %v2830_v58 }
0x121f   :  { %v2838_v60 = vpop.permute.xlu0 %2837 }
0x1220   :  { %v2870_v4 = vsel %vm2869_vm6, %v2867_v3, %v2838_v60 }
0x1223   :  { %v2846_v1 = vpop.permute.xlu0 %2845 }
0x1224   :  { %v2873_v10 = vsel %vm2872_vm8, %v2870_v4, %v2846_v1 }
0x12cc   :  { %v2723_v48 = vpop.f32.mrf.mxu0 }
0x12cd   :  { %2853 = vrot.lane.b32.xlu0 %v2723_v48, %s3523_s2 }
0x12ce   :  { %v3284_v49 = vpop.f32.mrf.mxu0 }
0x12dc   :  { %v2799_v51 = vpop.f32.mrf.mxu1 }
0x12dd   :  { %2855 = vrot.lane.b32.xlu1 %v2799_v51, %s3523_s2 }
0x12de   :  { %v3289_v52 = vpop.f32.mrf.mxu1 }
0x133f   :  { %v2854_v11 = vpop.permute.xlu0 %2853 }
0x1340   :  { %v2876_v12 = vsel %vm2875_vm7, %v2873_v10, %v2854_v11 }
0x1341   :  { %3298 = vmatprep.mubr.msk.f32.mxu0 %vm65_vm0, %v2876_v12 }
0x134f   :  { %v2856_v22 = vpop.permute.xlu1 %2855 }
0x1350   :  { %v2877_v23 = vsel %vm2875_vm7, %v2874_v21, %v2856_v22 }
0x1351   :  { %3299 = vmatmul.mubr.msk.f32.vlgmr.msra.gmra.mxu0 %vm65_vm0, %v2877_v23 }
0x1411   :  { %v3300_v47 = vpop.f32.mrf.mxu0 }
0x1412   :  { %v2967_v26 = vadd.f32 %v3300_v47, %v3040_v24 }
0x1413   :  { %v2961_v27 = vpop.f32.mrf.mxu0 }
0x1414   :  { %2971 = vst.msk [vmem:[#allocation8 + $0x8] sm:$0xff] %vm65_vm0, %v2967_v26  ;;  %v2962_v28 = vadd.f32 %v3040_v24, %v2961_v27 }
0x1416   :  { %2970 = vst.msk [vmem:[#allocation8] sm:$0xff] %vm65_vm0, %v2962_v28 }
0x1417   :  { %3473 = shalt.err (!%p3470_p5)
}
0x1418   :  { %2983 = dma.vmem_to_hbm [thread:$0]  %s2978_s8, 256, %s3865_s4, [#allocation4], %s3490_s20, %s3490_s20, %s3491_s21  }
0x1419   :  { %3486 = dma.done.wait [#allocation4], 256  }
0x141a   :  { %3487 = vsyncadd [#allocation4], 4294967040 }
0x141b   :  { %2987 = vsyncpa [#allocation3], 1 }
0x141c   :  { %2988 = vsyncpa [#allocation6], 1 }
0x141d   :  { %2989 = vsyncpa [#allocation4], 1 }

</bundles_post_ra>
